<compile_context>
chip_gen: v7x
topology: tpu7x:2x2x1
jax: 0.10.0
libtpu: 0.0.40
codegen_flags: <defaults>
</compile_context>

<pallas_src>
import functools

import jax
import jax.numpy as jnp
import numpy as np
from jax import lax
from jax.experimental import pallas as pl
from jax.experimental.pallas import tpu as pltpu

_PAD = 16  # channel padding granularity: one bf16 sublane tile (also 2x f32 tiles)


def _round_up(x, m):
    return (x + m - 1) // m * m


def _fused_cnn_kernel(x_ref, mask_ref, *wb_and_out, W, KH, KW, n_layers,
                      relu_flags):
    """Entire CNN forward for one batch chunk (channel-major, flat spatial).

    x_ref    : (Cin0_p, L)          input chunk, L = chunk*H*W lanes
    mask_ref : (KH*KW, L) f32       per-tap 'same'-padding validity (0/1)
    wb_and_out: w_0, b_0, ..., w_{L-1}, b_{L-1}, o_ref
      w_l    : (Cout_p_l, KH*KW*Cin_p_l)  bf16, tap-major then channel
      b_l    : (Cout_p_l, 1)              f32
      o_ref  : (Cout_p_last, L)           f32
    """
    wb_refs = wb_and_out[:2 * n_layers]
    o_ref = wb_and_out[2 * n_layers]

    ph, pw = KH // 2, KW // 2

    masks = mask_ref[...]                       # (n_taps, L) f32, loaded once
    act = x_ref[...]                            # (Cin0_p, L) f32
    L = act.shape[1]

    for l in range(n_layers):
        w = wb_refs[2 * l][...]                 # (Cout_p, KH*KW*Cin_p) bf16
        b = wb_refs[2 * l + 1][...]             # (Cout_p, 1) f32

        # ---- im2col in registers: one XLU roll + mask per kernel tap ----
        blocks = []
        for kh in range(KH):
            for kw in range(KW):
                off = (kh - ph) * W + (kw - pw)   # flat spatial shift
                tap = kh * KW + kw
                if off % L != 0:
                    # shifted[p] = act[(p + off) mod L]; wrapped lanes (across
                    # rows / images / chunk ends) are zeroed by the tap mask.
                    shifted = pltpu.roll(act, (-off) % L, axis=1)
                else:
                    shifted = act
                blocks.append(
                    (shifted * masks[tap:tap + 1, :]).astype(jnp.bfloat16))
        patch = jnp.concatenate(blocks, axis=0)   # (KH*KW*Cin_p, L) bf16

        # ---- one big-K bf16 MXU matmul per layer, f32 acc, fused bias+ReLU --
        y = jnp.dot(w, patch, preferred_element_type=jnp.float32)
        y = y + b
        if relu_flags[l]:
            y = jnp.maximum(y, 0.0)

        if l == n_layers - 1:
            o_ref[...] = y.astype(o_ref.dtype)
        else:
            act = y                               # stays vreg/VMEM resident


def _prep_layer_params(w, b, cin_p, cout_p):
    """(KH,KW,Cin,Cout) HWIO -> zero-padded (Cout_p, KH*KW*Cin_p) bf16 matrix."""
    KH, KW, Cin, Cout = w.shape
    w_p = jnp.zeros((KH, KW, cin_p, cout_p), jnp.float32)
    w_p = w_p.at[:, :, :Cin, :Cout].set(w.astype(jnp.float32))
    b_p = jnp.zeros((cout_p,), jnp.float32).at[:Cout].set(b.astype(jnp.float32))
    w2 = jnp.transpose(w_p, (3, 0, 1, 2)).reshape(cout_p, KH * KW * cin_p)
    return w2.astype(jnp.bfloat16), b_p.reshape(cout_p, 1)


def _tap_masks(H, W, KH, KW):
    """0/1 mask per tap: which flat output positions read a valid input."""
    ph, pw = KH // 2, KW // 2
    row = np.arange(H * W) // W
    col = np.arange(H * W) % W
    masks = np.zeros((KH * KW, H * W), np.float32)
    for kh in range(KH):
        for kw in range(KW):
            dh, dw = kh - ph, kw - pw
            valid = ((row + dh >= 0) & (row + dh < H) &
                     (col + dw >= 0) & (col + dw < W))
            masks[kh * KW + kw] = valid.astype(np.float32)
    return jnp.asarray(masks)


def simple_cnn_forward(x_nchw, params):
    """Forward pass of SimpleCNN.  Input/output are NCHW like PyTorch."""
    N, Cin0, H, W = x_nchw.shape
    HW = H * W
    n_layers = len(params)
    KH, KW, _, _ = params[0][0].shape
    # TODO(synk): even kernel sizes (PyTorch padding=k//2 changes the output
    # size) are not supported; odd kernel sizes keep 'same' spatial dims.
    relu_flags = tuple(i < n_layers - 1 for i in range(n_layers))

    # Padded channel plan (multiples of 16 -> sublane-tile aligned blocks).
    chan = [Cin0] + [w.shape[3] for w, _ in params]
    chan_p = [_round_up(c, _PAD) for c in chan]
    cout_last, cout_last_p = chan[-1], chan_p[-1]

    # Batch chunking: aim for >= ~1024 lanes per grid step, but keep >= 2 grid
    # steps whenever N >= 2 so both v7x TensorCores get work ("parallel" axis).
    chunk = max(1, 1024 // HW)
    if N >= 2:
        chunk = max(1, min(chunk, N // 2))
    chunk = min(chunk, N)
    n_steps = pl.cdiv(N, chunk)
    n_pad = n_steps * chunk
    L = chunk * HW

    # Pack input: (N, Cin0, H, W) -> (Cin0_p, N_pad*HW), channel-major with the
    # batch folded into the lane axis (one transpose outside the kernel).
    x_flat = x_nchw.reshape(N, Cin0, HW).astype(jnp.float32)
    x_flat = jnp.pad(x_flat, ((0, n_pad - N), (0, chan_p[0] - Cin0), (0, 0)))
    x_packed = jnp.transpose(x_flat, (1, 0, 2)).reshape(chan_p[0], n_pad * HW)

    # Per-tap masks, tiled across the images of one chunk.
    masks = jnp.tile(_tap_masks(H, W, KH, KW), (1, chunk))  # (n_taps, L) f32

    flat_params, wb_specs = [], []
    flops = 0
    for i, (w, b) in enumerate(params):
        w2, b2 = _prep_layer_params(w, b, chan_p[i], chan_p[i + 1])
        flat_params += [w2, b2]
        wb_specs += [pl.BlockSpec(w2.shape, lambda g: (0, 0)),
                     pl.BlockSpec(b2.shape, lambda g: (0, 0))]
        flops += 2 * KH * KW * chan_p[i] * chan_p[i + 1] * n_pad * HW

    bytes_accessed = int(
        x_packed.size * 4 + masks.size * 4
        + sum(int(p.size) * p.dtype.itemsize for p in flat_params)
        + cout_last_p * n_pad * HW * 4)

    kernel = functools.partial(
        _fused_cnn_kernel, W=W, KH=KH, KW=KW,
        n_layers=n_layers, relu_flags=relu_flags)

    out_packed = pl.pallas_call(
        kernel,
        out_shape=jax.ShapeDtypeStruct((cout_last_p, n_pad * HW), jnp.float32),
        grid=(n_steps,),
        in_specs=[
            pl.BlockSpec((chan_p[0], L), lambda g: (0, g)),
            pl.BlockSpec(masks.shape, lambda g: (0, 0)),
            *wb_specs,
        ],
        out_specs=pl.BlockSpec((cout_last_p, L), lambda g: (0, g)),
        compiler_params=pltpu.CompilerParams(
            dimension_semantics=("parallel",),
            vmem_limit_bytes=32 * 1024 * 1024),
        cost_estimate=pl.CostEstimate(
            flops=int(flops), transcendentals=0,
            bytes_accessed=bytes_accessed),
    )(x_packed, masks, *flat_params)

    # (Cout_p, N_pad*HW) -> NCHW, dropping channel / batch padding.
    out = out_packed.reshape(cout_last_p, n_pad, HW)
    out = jnp.transpose(out, (1, 0, 2))[:N, :cout_last]
    return out.reshape(N, cout_last, H, W)


def init_simple_cnn_params(key, n_in_channels, n_hidden_layers, n_kernels,
                           kernel_size, n_out_channels):
    """Deterministic param init (shapes match the PyTorch module, HWIO)."""
    params = []
    c_in = n_in_channels
    channel_plan = [n_kernels] * n_hidden_layers + [n_out_channels]
    for c_out in channel_plan:
        key, kw_key, kb_key = jax.random.split(key, 3)
        fan_in = c_in * kernel_size * kernel_size
        scale = 1.0 / jnp.sqrt(jnp.float32(fan_in))
        w = jax.random.uniform(kw_key,
                               (kernel_size, kernel_size, c_in, c_out),
                               dtype=jnp.float32, minval=-scale, maxval=scale)
        b = jax.random.uniform(kb_key, (c_out,), dtype=jnp.float32,
                               minval=-scale, maxval=scale)
        params.append((w, b))
        c_in = c_out
    return params


def _reference_forward(x_nchw, params):
    """Pure-JAX reference (lax conv, f32) for correctness checking."""
    x = jnp.transpose(x_nchw, (0, 2, 3, 1))
    n_layers = len(params)
    for i, (w, b) in enumerate(params):
        pad = w.shape[0] // 2
        y = lax.conv_general_dilated(
            x, w, window_strides=(1, 1),
            padding=((pad, pad), (pad, pad)),
            dimension_numbers=("NHWC", "HWIO", "NHWC"))
        y = y + b
        if i < n_layers - 1:
            y = jnp.maximum(y, 0.0)
        x = y
    return jnp.transpose(x, (0, 3, 1, 2))


if __name__ == "__main__":
    # Small hyperparameters consistent with the module's constructor.
    n_in_channels = 4
    n_hidden_layers = 3
    n_kernels = 16
    kernel_size = 3
    n_out_channels = 4

    batch, spatial = 2, 16

    key = jax.random.PRNGKey(0)
    key, x_key = jax.random.split(key)
    x = jax.random.normal(x_key, (batch, n_in_channels, spatial, spatial),
                          dtype=jnp.float32)

    params = init_simple_cnn_params(key, n_in_channels, n_hidden_layers,
                                    n_kernels, kernel_size, n_out_channels)

    out = jax.block_until_ready(simple_cnn_forward(x, params))
    assert out.shape == (batch, n_out_channels, spatial, spatial), out.shape

    ref = jax.block_until_ready(_reference_forward(x, params))
    max_err = float(jnp.max(jnp.abs(out - ref)))
    # bf16 MXU inputs with f32 accumulation: tolerance relaxed vs. the pure-f32
    # version (was 1e-4); real bugs produce O(1) errors, far above this.
    assert jnp.allclose(out, ref, atol=5e-2, rtol=5e-2), max_err
    print("KERNEL_OK")
</pallas_src>

<mosaic_0001>
module attributes {stable_mosaic.version = 11 : i64} {
  func.func @_fused_cnn_kernel(%arg0: i32, %arg1: memref<16x256xf32, #tpu.memory_space<vmem>>, %arg2: memref<9x256xf32, #tpu.memory_space<vmem>>, %arg3: memref<16x144xbf16, #tpu.memory_space<vmem>>, %arg4: memref<16x1xf32, #tpu.memory_space<vmem>>, %arg5: memref<16x144xbf16, #tpu.memory_space<vmem>>, %arg6: memref<16x1xf32, #tpu.memory_space<vmem>>, %arg7: memref<16x144xbf16, #tpu.memory_space<vmem>>, %arg8: memref<16x1xf32, #tpu.memory_space<vmem>>, %arg9: memref<16x144xbf16, #tpu.memory_space<vmem>>, %arg10: memref<16x1xf32, #tpu.memory_space<vmem>>, %arg11: memref<16x256xf32, #tpu.memory_space<vmem>>) attributes {dimension_semantics = [#tpu.dimension_semantics<parallel>], iteration_bounds = array<i64: 2>, scalar_prefetch = 0 : i64, scratch_operands = 0 : i64, tpu.core_type = #tpu.core_type<tc>, window_params = [{transform_indices = @transform_0, window_bounds = array<i64: 16, 256>}, {pipeline_mode = #tpu.pipeline_mode<synchronous>, transform_indices = @transform_1, window_bounds = array<i64: 9, 256>}, {pipeline_mode = #tpu.pipeline_mode<synchronous>, transform_indices = @transform_2, window_bounds = array<i64: 16, 144>}, {pipeline_mode = #tpu.pipeline_mode<synchronous>, transform_indices = @transform_3, window_bounds = array<i64: 16, 1>}, {pipeline_mode = #tpu.pipeline_mode<synchronous>, transform_indices = @transform_4, window_bounds = array<i64: 16, 144>}, {pipeline_mode = #tpu.pipeline_mode<synchronous>, transform_indices = @transform_5, window_bounds = array<i64: 16, 1>}, {pipeline_mode = #tpu.pipeline_mode<synchronous>, transform_indices = @transform_6, window_bounds = array<i64: 16, 144>}, {pipeline_mode = #tpu.pipeline_mode<synchronous>, transform_indices = @transform_7, window_bounds = array<i64: 16, 1>}, {pipeline_mode = #tpu.pipeline_mode<synchronous>, transform_indices = @transform_8, window_bounds = array<i64: 16, 144>}, {pipeline_mode = #tpu.pipeline_mode<synchronous>, transform_indices = @transform_9, window_bounds = array<i64: 16, 1>}, {transform_indices = @transform_10, window_bounds = array<i64: 16, 256>}]} {
    %c0 = arith.constant 0 : index
    %c0_0 = arith.constant 0 : index
    %0 = vector.load %arg2[%c0, %c0_0] : memref<9x256xf32, #tpu.memory_space<vmem>>, vector<9x256xf32>
    %c0_1 = arith.constant 0 : index
    %c0_2 = arith.constant 0 : index
    %1 = vector.load %arg1[%c0_1, %c0_2] : memref<16x256xf32, #tpu.memory_space<vmem>>, vector<16x256xf32>
    %c0_3 = arith.constant 0 : index
    %c0_4 = arith.constant 0 : index
    %2 = vector.load %arg3[%c0_3, %c0_4] : memref<16x144xbf16, #tpu.memory_space<vmem>>, vector<16x144xbf16>
    %c0_5 = arith.constant 0 : index
    %c0_6 = arith.constant 0 : index
    %3 = vector.load %arg4[%c0_5, %c0_6] : memref<16x1xf32, #tpu.memory_space<vmem>>, vector<16x1xf32>
    %c17_i32 = arith.constant 17 : i32
    %4 = tpu.dynamic_rotate %1 by %c17_i32 dim 1 : vector<16x256xf32>, i32 -> vector<16x256xf32>
    %5 = vector.extract_strided_slice %0 {offsets = [0, 0], sizes = [1, 256], strides = [1, 1]} : vector<9x256xf32> to vector<1x256xf32>
    %6 = vector.broadcast %5 : vector<1x256xf32> to vector<16x256xf32>
    %7 = arith.mulf %4, %6 : vector<16x256xf32>
    %8 = arith.truncf %7 : vector<16x256xf32> to vector<16x256xbf16>
    %c16_i32 = arith.constant 16 : i32
    %9 = tpu.dynamic_rotate %1 by %c16_i32 dim 1 : vector<16x256xf32>, i32 -> vector<16x256xf32>
    %10 = vector.extract_strided_slice %0 {offsets = [1, 0], sizes = [1, 256], strides = [1, 1]} : vector<9x256xf32> to vector<1x256xf32>
    %11 = vector.broadcast %10 : vector<1x256xf32> to vector<16x256xf32>
    %12 = arith.mulf %9, %11 : vector<16x256xf32>
    %13 = arith.truncf %12 : vector<16x256xf32> to vector<16x256xbf16>
    %c15_i32 = arith.constant 15 : i32
    %14 = tpu.dynamic_rotate %1 by %c15_i32 dim 1 : vector<16x256xf32>, i32 -> vector<16x256xf32>
    %15 = vector.extract_strided_slice %0 {offsets = [2, 0], sizes = [1, 256], strides = [1, 1]} : vector<9x256xf32> to vector<1x256xf32>
    %16 = vector.broadcast %15 : vector<1x256xf32> to vector<16x256xf32>
    %17 = arith.mulf %14, %16 : vector<16x256xf32>
    %18 = arith.truncf %17 : vector<16x256xf32> to vector<16x256xbf16>
    %c1_i32 = arith.constant 1 : i32
    %19 = tpu.dynamic_rotate %1 by %c1_i32 dim 1 : vector<16x256xf32>, i32 -> vector<16x256xf32>
    %20 = vector.extract_strided_slice %0 {offsets = [3, 0], sizes = [1, 256], strides = [1, 1]} : vector<9x256xf32> to vector<1x256xf32>
    %21 = vector.broadcast %20 : vector<1x256xf32> to vector<16x256xf32>
    %22 = arith.mulf %19, %21 : vector<16x256xf32>
    %23 = arith.truncf %22 : vector<16x256xf32> to vector<16x256xbf16>
    %24 = vector.extract_strided_slice %0 {offsets = [4, 0], sizes = [1, 256], strides = [1, 1]} : vector<9x256xf32> to vector<1x256xf32>
    %25 = vector.broadcast %24 : vector<1x256xf32> to vector<16x256xf32>
    %26 = arith.mulf %1, %25 : vector<16x256xf32>
    %27 = arith.truncf %26 : vector<16x256xf32> to vector<16x256xbf16>
    %c255_i32 = arith.constant 255 : i32
    %28 = tpu.dynamic_rotate %1 by %c255_i32 dim 1 : vector<16x256xf32>, i32 -> vector<16x256xf32>
    %29 = vector.extract_strided_slice %0 {offsets = [5, 0], sizes = [1, 256], strides = [1, 1]} : vector<9x256xf32> to vector<1x256xf32>
    %30 = vector.broadcast %29 : vector<1x256xf32> to vector<16x256xf32>
    %31 = arith.mulf %28, %30 : vector<16x256xf32>
    %32 = arith.truncf %31 : vector<16x256xf32> to vector<16x256xbf16>
    %c241_i32 = arith.constant 241 : i32
    %33 = tpu.dynamic_rotate %1 by %c241_i32 dim 1 : vector<16x256xf32>, i32 -> vector<16x256xf32>
    %34 = vector.extract_strided_slice %0 {offsets = [6, 0], sizes = [1, 256], strides = [1, 1]} : vector<9x256xf32> to vector<1x256xf32>
    %35 = vector.broadcast %34 : vector<1x256xf32> to vector<16x256xf32>
    %36 = arith.mulf %33, %35 : vector<16x256xf32>
    %37 = arith.truncf %36 : vector<16x256xf32> to vector<16x256xbf16>
    %c240_i32 = arith.constant 240 : i32
    %38 = tpu.dynamic_rotate %1 by %c240_i32 dim 1 : vector<16x256xf32>, i32 -> vector<16x256xf32>
    %39 = vector.extract_strided_slice %0 {offsets = [7, 0], sizes = [1, 256], strides = [1, 1]} : vector<9x256xf32> to vector<1x256xf32>
    %40 = vector.broadcast %39 : vector<1x256xf32> to vector<16x256xf32>
    %41 = arith.mulf %38, %40 : vector<16x256xf32>
    %42 = arith.truncf %41 : vector<16x256xf32> to vector<16x256xbf16>
    %c239_i32 = arith.constant 239 : i32
    %43 = tpu.dynamic_rotate %1 by %c239_i32 dim 1 : vector<16x256xf32>, i32 -> vector<16x256xf32>
    %44 = vector.extract_strided_slice %0 {offsets = [8, 0], sizes = [1, 256], strides = [1, 1]} : vector<9x256xf32> to vector<1x256xf32>
    %45 = vector.broadcast %44 : vector<1x256xf32> to vector<16x256xf32>
    %46 = arith.mulf %43, %45 : vector<16x256xf32>
    %47 = arith.truncf %46 : vector<16x256xf32> to vector<16x256xbf16>
    %48 = tpu.concatenate %8, %13, %18, %23, %27, %32, %37, %42, %47 in 0 : vector<16x256xbf16>, vector<16x256xbf16>, vector<16x256xbf16>, vector<16x256xbf16>, vector<16x256xbf16>, vector<16x256xbf16>, vector<16x256xbf16>, vector<16x256xbf16>, vector<16x256xbf16> -> vector<144x256xbf16>
    %cst = arith.constant dense<0.000000e+00> : vector<16x256xf32>
    %49 = tpu.matmul %2, %48, %cst {dimension_numbers = #tpu.dot_dimension_numbers<[1], [0], [0], [1], [0, 0, 1, 1], [], []>} : vector<16x144xbf16>, vector<144x256xbf16>, vector<16x256xf32> -> vector<16x256xf32>
    %50 = vector.broadcast %3 : vector<16x1xf32> to vector<16x256xf32>
    %51 = arith.addf %49, %50 : vector<16x256xf32>
    %cst_7 = arith.constant 0.000000e+00 : f32
    %52 = vector.broadcast %cst_7 : f32 to vector<16x256xf32>
    %53 = arith.maximumf %51, %52 : vector<16x256xf32>
    %c0_8 = arith.constant 0 : index
    %c0_9 = arith.constant 0 : index
    %54 = vector.load %arg5[%c0_8, %c0_9] : memref<16x144xbf16, #tpu.memory_space<vmem>>, vector<16x144xbf16>
    %c0_10 = arith.constant 0 : index
    %c0_11 = arith.constant 0 : index
    %55 = vector.load %arg6[%c0_10, %c0_11] : memref<16x1xf32, #tpu.memory_space<vmem>>, vector<16x1xf32>
    %c17_i32_12 = arith.constant 17 : i32
    %56 = tpu.dynamic_rotate %53 by %c17_i32_12 dim 1 : vector<16x256xf32>, i32 -> vector<16x256xf32>
    %57 = vector.extract_strided_slice %0 {offsets = [0, 0], sizes = [1, 256], strides = [1, 1]} : vector<9x256xf32> to vector<1x256xf32>
    %58 = vector.broadcast %57 : vector<1x256xf32> to vector<16x256xf32>
    %59 = arith.mulf %56, %58 : vector<16x256xf32>
    %60 = arith.truncf %59 : vector<16x256xf32> to vector<16x256xbf16>
    %c16_i32_13 = arith.constant 16 : i32
    %61 = tpu.dynamic_rotate %53 by %c16_i32_13 dim 1 : vector<16x256xf32>, i32 -> vector<16x256xf32>
    %62 = vector.extract_strided_slice %0 {offsets = [1, 0], sizes = [1, 256], strides = [1, 1]} : vector<9x256xf32> to vector<1x256xf32>
    %63 = vector.broadcast %62 : vector<1x256xf32> to vector<16x256xf32>
    %64 = arith.mulf %61, %63 : vector<16x256xf32>
    %65 = arith.truncf %64 : vector<16x256xf32> to vector<16x256xbf16>
    %c15_i32_14 = arith.constant 15 : i32
    %66 = tpu.dynamic_rotate %53 by %c15_i32_14 dim 1 : vector<16x256xf32>, i32 -> vector<16x256xf32>
    %67 = vector.extract_strided_slice %0 {offsets = [2, 0], sizes = [1, 256], strides = [1, 1]} : vector<9x256xf32> to vector<1x256xf32>
    %68 = vector.broadcast %67 : vector<1x256xf32> to vector<16x256xf32>
    %69 = arith.mulf %66, %68 : vector<16x256xf32>
    %70 = arith.truncf %69 : vector<16x256xf32> to vector<16x256xbf16>
    %c1_i32_15 = arith.constant 1 : i32
    %71 = tpu.dynamic_rotate %53 by %c1_i32_15 dim 1 : vector<16x256xf32>, i32 -> vector<16x256xf32>
    %72 = vector.extract_strided_slice %0 {offsets = [3, 0], sizes = [1, 256], strides = [1, 1]} : vector<9x256xf32> to vector<1x256xf32>
    %73 = vector.broadcast %72 : vector<1x256xf32> to vector<16x256xf32>
    %74 = arith.mulf %71, %73 : vector<16x256xf32>
    %75 = arith.truncf %74 : vector<16x256xf32> to vector<16x256xbf16>
    %76 = vector.extract_strided_slice %0 {offsets = [4, 0], sizes = [1, 256], strides = [1, 1]} : vector<9x256xf32> to vector<1x256xf32>
    %77 = vector.broadcast %76 : vector<1x256xf32> to vector<16x256xf32>
    %78 = arith.mulf %53, %77 : vector<16x256xf32>
    %79 = arith.truncf %78 : vector<16x256xf32> to vector<16x256xbf16>
    %c255_i32_16 = arith.constant 255 : i32
    %80 = tpu.dynamic_rotate %53 by %c255_i32_16 dim 1 : vector<16x256xf32>, i32 -> vector<16x256xf32>
    %81 = vector.extract_strided_slice %0 {offsets = [5, 0], sizes = [1, 256], strides = [1, 1]} : vector<9x256xf32> to vector<1x256xf32>
    %82 = vector.broadcast %81 : vector<1x256xf32> to vector<16x256xf32>
    %83 = arith.mulf %80, %82 : vector<16x256xf32>
    %84 = arith.truncf %83 : vector<16x256xf32> to vector<16x256xbf16>
    %c241_i32_17 = arith.constant 241 : i32
    %85 = tpu.dynamic_rotate %53 by %c241_i32_17 dim 1 : vector<16x256xf32>, i32 -> vector<16x256xf32>
    %86 = vector.extract_strided_slice %0 {offsets = [6, 0], sizes = [1, 256], strides = [1, 1]} : vector<9x256xf32> to vector<1x256xf32>
    %87 = vector.broadcast %86 : vector<1x256xf32> to vector<16x256xf32>
    %88 = arith.mulf %85, %87 : vector<16x256xf32>
    %89 = arith.truncf %88 : vector<16x256xf32> to vector<16x256xbf16>
    %c240_i32_18 = arith.constant 240 : i32
    %90 = tpu.dynamic_rotate %53 by %c240_i32_18 dim 1 : vector<16x256xf32>, i32 -> vector<16x256xf32>
    %91 = vector.extract_strided_slice %0 {offsets = [7, 0], sizes = [1, 256], strides = [1, 1]} : vector<9x256xf32> to vector<1x256xf32>
    %92 = vector.broadcast %91 : vector<1x256xf32> to vector<16x256xf32>
    %93 = arith.mulf %90, %92 : vector<16x256xf32>
    %94 = arith.truncf %93 : vector<16x256xf32> to vector<16x256xbf16>
    %c239_i32_19 = arith.constant 239 : i32
    %95 = tpu.dynamic_rotate %53 by %c239_i32_19 dim 1 : vector<16x256xf32>, i32 -> vector<16x256xf32>
    %96 = vector.extract_strided_slice %0 {offsets = [8, 0], sizes = [1, 256], strides = [1, 1]} : vector<9x256xf32> to vector<1x256xf32>
    %97 = vector.broadcast %96 : vector<1x256xf32> to vector<16x256xf32>
    %98 = arith.mulf %95, %97 : vector<16x256xf32>
    %99 = arith.truncf %98 : vector<16x256xf32> to vector<16x256xbf16>
    %100 = tpu.concatenate %60, %65, %70, %75, %79, %84, %89, %94, %99 in 0 : vector<16x256xbf16>, vector<16x256xbf16>, vector<16x256xbf16>, vector<16x256xbf16>, vector<16x256xbf16>, vector<16x256xbf16>, vector<16x256xbf16>, vector<16x256xbf16>, vector<16x256xbf16> -> vector<144x256xbf16>
    %cst_20 = arith.constant dense<0.000000e+00> : vector<16x256xf32>
    %101 = tpu.matmul %54, %100, %cst_20 {dimension_numbers = #tpu.dot_dimension_numbers<[1], [0], [0], [1], [0, 0, 1, 1], [], []>} : vector<16x144xbf16>, vector<144x256xbf16>, vector<16x256xf32> -> vector<16x256xf32>
    %102 = vector.broadcast %55 : vector<16x1xf32> to vector<16x256xf32>
    %103 = arith.addf %101, %102 : vector<16x256xf32>
    %cst_21 = arith.constant 0.000000e+00 : f32
    %104 = vector.broadcast %cst_21 : f32 to vector<16x256xf32>
    %105 = arith.maximumf %103, %104 : vector<16x256xf32>
    %c0_22 = arith.constant 0 : index
    %c0_23 = arith.constant 0 : index
    %106 = vector.load %arg7[%c0_22, %c0_23] : memref<16x144xbf16, #tpu.memory_space<vmem>>, vector<16x144xbf16>
    %c0_24 = arith.constant 0 : index
    %c0_25 = arith.constant 0 : index
    %107 = vector.load %arg8[%c0_24, %c0_25] : memref<16x1xf32, #tpu.memory_space<vmem>>, vector<16x1xf32>
    %c17_i32_26 = arith.constant 17 : i32
    %108 = tpu.dynamic_rotate %105 by %c17_i32_26 dim 1 : vector<16x256xf32>, i32 -> vector<16x256xf32>
    %109 = vector.extract_strided_slice %0 {offsets = [0, 0], sizes = [1, 256], strides = [1, 1]} : vector<9x256xf32> to vector<1x256xf32>
    %110 = vector.broadcast %109 : vector<1x256xf32> to vector<16x256xf32>
    %111 = arith.mulf %108, %110 : vector<16x256xf32>
    %112 = arith.truncf %111 : vector<16x256xf32> to vector<16x256xbf16>
    %c16_i32_27 = arith.constant 16 : i32
    %113 = tpu.dynamic_rotate %105 by %c16_i32_27 dim 1 : vector<16x256xf32>, i32 -> vector<16x256xf32>
    %114 = vector.extract_strided_slice %0 {offsets = [1, 0], sizes = [1, 256], strides = [1, 1]} : vector<9x256xf32> to vector<1x256xf32>
    %115 = vector.broadcast %114 : vector<1x256xf32> to vector<16x256xf32>
    %116 = arith.mulf %113, %115 : vector<16x256xf32>
    %117 = arith.truncf %116 : vector<16x256xf32> to vector<16x256xbf16>
    %c15_i32_28 = arith.constant 15 : i32
    %118 = tpu.dynamic_rotate %105 by %c15_i32_28 dim 1 : vector<16x256xf32>, i32 -> vector<16x256xf32>
    %119 = vector.extract_strided_slice %0 {offsets = [2, 0], sizes = [1, 256], strides = [1, 1]} : vector<9x256xf32> to vector<1x256xf32>
    %120 = vector.broadcast %119 : vector<1x256xf32> to vector<16x256xf32>
    %121 = arith.mulf %118, %120 : vector<16x256xf32>
    %122 = arith.truncf %121 : vector<16x256xf32> to vector<16x256xbf16>
    %c1_i32_29 = arith.constant 1 : i32
    %123 = tpu.dynamic_rotate %105 by %c1_i32_29 dim 1 : vector<16x256xf32>, i32 -> vector<16x256xf32>
    %124 = vector.extract_strided_slice %0 {offsets = [3, 0], sizes = [1, 256], strides = [1, 1]} : vector<9x256xf32> to vector<1x256xf32>
    %125 = vector.broadcast %124 : vector<1x256xf32> to vector<16x256xf32>
    %126 = arith.mulf %123, %125 : vector<16x256xf32>
    %127 = arith.truncf %126 : vector<16x256xf32> to vector<16x256xbf16>
    %128 = vector.extract_strided_slice %0 {offsets = [4, 0], sizes = [1, 256], strides = [1, 1]} : vector<9x256xf32> to vector<1x256xf32>
    %129 = vector.broadcast %128 : vector<1x256xf32> to vector<16x256xf32>
    %130 = arith.mulf %105, %129 : vector<16x256xf32>
    %131 = arith.truncf %130 : vector<16x256xf32> to vector<16x256xbf16>
    %c255_i32_30 = arith.constant 255 : i32
    %132 = tpu.dynamic_rotate %105 by %c255_i32_30 dim 1 : vector<16x256xf32>, i32 -> vector<16x256xf32>
    %133 = vector.extract_strided_slice %0 {offsets = [5, 0], sizes = [1, 256], strides = [1, 1]} : vector<9x256xf32> to vector<1x256xf32>
    %134 = vector.broadcast %133 : vector<1x256xf32> to vector<16x256xf32>
    %135 = arith.mulf %132, %134 : vector<16x256xf32>
    %136 = arith.truncf %135 : vector<16x256xf32> to vector<16x256xbf16>
    %c241_i32_31 = arith.constant 241 : i32
    %137 = tpu.dynamic_rotate %105 by %c241_i32_31 dim 1 : vector<16x256xf32>, i32 -> vector<16x256xf32>
    %138 = vector.extract_strided_slice %0 {offsets = [6, 0], sizes = [1, 256], strides = [1, 1]} : vector<9x256xf32> to vector<1x256xf32>
    %139 = vector.broadcast %138 : vector<1x256xf32> to vector<16x256xf32>
    %140 = arith.mulf %137, %139 : vector<16x256xf32>
    %141 = arith.truncf %140 : vector<16x256xf32> to vector<16x256xbf16>
    %c240_i32_32 = arith.constant 240 : i32
    %142 = tpu.dynamic_rotate %105 by %c240_i32_32 dim 1 : vector<16x256xf32>, i32 -> vector<16x256xf32>
    %143 = vector.extract_strided_slice %0 {offsets = [7, 0], sizes = [1, 256], strides = [1, 1]} : vector<9x256xf32> to vector<1x256xf32>
    %144 = vector.broadcast %143 : vector<1x256xf32> to vector<16x256xf32>
    %145 = arith.mulf %142, %144 : vector<16x256xf32>
    %146 = arith.truncf %145 : vector<16x256xf32> to vector<16x256xbf16>
    %c239_i32_33 = arith.constant 239 : i32
    %147 = tpu.dynamic_rotate %105 by %c239_i32_33 dim 1 : vector<16x256xf32>, i32 -> vector<16x256xf32>
    %148 = vector.extract_strided_slice %0 {offsets = [8, 0], sizes = [1, 256], strides = [1, 1]} : vector<9x256xf32> to vector<1x256xf32>
    %149 = vector.broadcast %148 : vector<1x256xf32> to vector<16x256xf32>
    %150 = arith.mulf %147, %149 : vector<16x256xf32>
    %151 = arith.truncf %150 : vector<16x256xf32> to vector<16x256xbf16>
    %152 = tpu.concatenate %112, %117, %122, %127, %131, %136, %141, %146, %151 in 0 : vector<16x256xbf16>, vector<16x256xbf16>, vector<16x256xbf16>, vector<16x256xbf16>, vector<16x256xbf16>, vector<16x256xbf16>, vector<16x256xbf16>, vector<16x256xbf16>, vector<16x256xbf16> -> vector<144x256xbf16>
    %cst_34 = arith.constant dense<0.000000e+00> : vector<16x256xf32>
    %153 = tpu.matmul %106, %152, %cst_34 {dimension_numbers = #tpu.dot_dimension_numbers<[1], [0], [0], [1], [0, 0, 1, 1], [], []>} : vector<16x144xbf16>, vector<144x256xbf16>, vector<16x256xf32> -> vector<16x256xf32>
    %154 = vector.broadcast %107 : vector<16x1xf32> to vector<16x256xf32>
    %155 = arith.addf %153, %154 : vector<16x256xf32>
    %cst_35 = arith.constant 0.000000e+00 : f32
    %156 = vector.broadcast %cst_35 : f32 to vector<16x256xf32>
    %157 = arith.maximumf %155, %156 : vector<16x256xf32>
    %c0_36 = arith.constant 0 : index
    %c0_37 = arith.constant 0 : index
    %158 = vector.load %arg9[%c0_36, %c0_37] : memref<16x144xbf16, #tpu.memory_space<vmem>>, vector<16x144xbf16>
    %c0_38 = arith.constant 0 : index
    %c0_39 = arith.constant 0 : index
    %159 = vector.load %arg10[%c0_38, %c0_39] : memref<16x1xf32, #tpu.memory_space<vmem>>, vector<16x1xf32>
    %c17_i32_40 = arith.constant 17 : i32
    %160 = tpu.dynamic_rotate %157 by %c17_i32_40 dim 1 : vector<16x256xf32>, i32 -> vector<16x256xf32>
    %161 = vector.extract_strided_slice %0 {offsets = [0, 0], sizes = [1, 256], strides = [1, 1]} : vector<9x256xf32> to vector<1x256xf32>
    %162 = vector.broadcast %161 : vector<1x256xf32> to vector<16x256xf32>
    %163 = arith.mulf %160, %162 : vector<16x256xf32>
    %164 = arith.truncf %163 : vector<16x256xf32> to vector<16x256xbf16>
    %c16_i32_41 = arith.constant 16 : i32
    %165 = tpu.dynamic_rotate %157 by %c16_i32_41 dim 1 : vector<16x256xf32>, i32 -> vector<16x256xf32>
    %166 = vector.extract_strided_slice %0 {offsets = [1, 0], sizes = [1, 256], strides = [1, 1]} : vector<9x256xf32> to vector<1x256xf32>
    %167 = vector.broadcast %166 : vector<1x256xf32> to vector<16x256xf32>
    %168 = arith.mulf %165, %167 : vector<16x256xf32>
    %169 = arith.truncf %168 : vector<16x256xf32> to vector<16x256xbf16>
    %c15_i32_42 = arith.constant 15 : i32
    %170 = tpu.dynamic_rotate %157 by %c15_i32_42 dim 1 : vector<16x256xf32>, i32 -> vector<16x256xf32>
    %171 = vector.extract_strided_slice %0 {offsets = [2, 0], sizes = [1, 256], strides = [1, 1]} : vector<9x256xf32> to vector<1x256xf32>
    %172 = vector.broadcast %171 : vector<1x256xf32> to vector<16x256xf32>
    %173 = arith.mulf %170, %172 : vector<16x256xf32>
    %174 = arith.truncf %173 : vector<16x256xf32> to vector<16x256xbf16>
    %c1_i32_43 = arith.constant 1 : i32
    %175 = tpu.dynamic_rotate %157 by %c1_i32_43 dim 1 : vector<16x256xf32>, i32 -> vector<16x256xf32>
    %176 = vector.extract_strided_slice %0 {offsets = [3, 0], sizes = [1, 256], strides = [1, 1]} : vector<9x256xf32> to vector<1x256xf32>
    %177 = vector.broadcast %176 : vector<1x256xf32> to vector<16x256xf32>
    %178 = arith.mulf %175, %177 : vector<16x256xf32>
    %179 = arith.truncf %178 : vector<16x256xf32> to vector<16x256xbf16>
    %180 = vector.extract_strided_slice %0 {offsets = [4, 0], sizes = [1, 256], strides = [1, 1]} : vector<9x256xf32> to vector<1x256xf32>
    %181 = vector.broadcast %180 : vector<1x256xf32> to vector<16x256xf32>
    %182 = arith.mulf %157, %181 : vector<16x256xf32>
    %183 = arith.truncf %182 : vector<16x256xf32> to vector<16x256xbf16>
    %c255_i32_44 = arith.constant 255 : i32
    %184 = tpu.dynamic_rotate %157 by %c255_i32_44 dim 1 : vector<16x256xf32>, i32 -> vector<16x256xf32>
    %185 = vector.extract_strided_slice %0 {offsets = [5, 0], sizes = [1, 256], strides = [1, 1]} : vector<9x256xf32> to vector<1x256xf32>
    %186 = vector.broadcast %185 : vector<1x256xf32> to vector<16x256xf32>
    %187 = arith.mulf %184, %186 : vector<16x256xf32>
    %188 = arith.truncf %187 : vector<16x256xf32> to vector<16x256xbf16>
    %c241_i32_45 = arith.constant 241 : i32
    %189 = tpu.dynamic_rotate %157 by %c241_i32_45 dim 1 : vector<16x256xf32>, i32 -> vector<16x256xf32>
    %190 = vector.extract_strided_slice %0 {offsets = [6, 0], sizes = [1, 256], strides = [1, 1]} : vector<9x256xf32> to vector<1x256xf32>
    %191 = vector.broadcast %190 : vector<1x256xf32> to vector<16x256xf32>
    %192 = arith.mulf %189, %191 : vector<16x256xf32>
    %193 = arith.truncf %192 : vector<16x256xf32> to vector<16x256xbf16>
    %c240_i32_46 = arith.constant 240 : i32
    %194 = tpu.dynamic_rotate %157 by %c240_i32_46 dim 1 : vector<16x256xf32>, i32 -> vector<16x256xf32>
    %195 = vector.extract_strided_slice %0 {offsets = [7, 0], sizes = [1, 256], strides = [1, 1]} : vector<9x256xf32> to vector<1x256xf32>
    %196 = vector.broadcast %195 : vector<1x256xf32> to vector<16x256xf32>
    %197 = arith.mulf %194, %196 : vector<16x256xf32>
    %198 = arith.truncf %197 : vector<16x256xf32> to vector<16x256xbf16>
    %c239_i32_47 = arith.constant 239 : i32
    %199 = tpu.dynamic_rotate %157 by %c239_i32_47 dim 1 : vector<16x256xf32>, i32 -> vector<16x256xf32>
    %200 = vector.extract_strided_slice %0 {offsets = [8, 0], sizes = [1, 256], strides = [1, 1]} : vector<9x256xf32> to vector<1x256xf32>
    %201 = vector.broadcast %200 : vector<1x256xf32> to vector<16x256xf32>
    %202 = arith.mulf %199, %201 : vector<16x256xf32>
    %203 = arith.truncf %202 : vector<16x256xf32> to vector<16x256xbf16>
    %204 = tpu.concatenate %164, %169, %174, %179, %183, %188, %193, %198, %203 in 0 : vector<16x256xbf16>, vector<16x256xbf16>, vector<16x256xbf16>, vector<16x256xbf16>, vector<16x256xbf16>, vector<16x256xbf16>, vector<16x256xbf16>, vector<16x256xbf16>, vector<16x256xbf16> -> vector<144x256xbf16>
    %cst_48 = arith.constant dense<0.000000e+00> : vector<16x256xf32>
    %205 = tpu.matmul %158, %204, %cst_48 {dimension_numbers = #tpu.dot_dimension_numbers<[1], [0], [0], [1], [0, 0, 1, 1], [], []>} : vector<16x144xbf16>, vector<144x256xbf16>, vector<16x256xf32> -> vector<16x256xf32>
    %206 = vector.broadcast %159 : vector<16x1xf32> to vector<16x256xf32>
    %207 = arith.addf %205, %206 : vector<16x256xf32>
    %c0_49 = arith.constant 0 : index
    %c0_50 = arith.constant 0 : index
    %208 = vector.load %arg11[%c0_49, %c0_50] : memref<16x256xf32, #tpu.memory_space<vmem>>, vector<16x256xf32>
    tpu.vector_store %arg11[%c0_49, %c0_50], %207 {strides = array<i32>} : memref<16x256xf32, #tpu.memory_space<vmem>>, vector<16x256xf32>,
    return
  }
  func.func @transform_0(%arg0: i32) -> (i32, i32) {
    %c0_i32 = arith.constant 0 : i32
    %c0_i32_0 = arith.constant 0 : i32
    return %c0_i32, %arg0 : i32, i32
  }
  func.func @transform_1(%arg0: i32) -> (i32, i32) {
    %c0_i32 = arith.constant 0 : i32
    %c0_i32_0 = arith.constant 0 : i32
    %c0_i32_1 = arith.constant 0 : i32
    return %c0_i32, %c0_i32_0 : i32, i32
  }
  func.func @transform_2(%arg0: i32) -> (i32, i32) {
    %c0_i32 = arith.constant 0 : i32
    %c0_i32_0 = arith.constant 0 : i32
    %c0_i32_1 = arith.constant 0 : i32
    return %c0_i32, %c0_i32_0 : i32, i32
  }
  func.func @transform_3(%arg0: i32) -> (i32, i32) {
    %c0_i32 = arith.constant 0 : i32
    %c0_i32_0 = arith.constant 0 : i32
    %c0_i32_1 = arith.constant 0 : i32
    return %c0_i32, %c0_i32_0 : i32, i32
  }
  func.func @transform_4(%arg0: i32) -> (i32, i32) {
    %c0_i32 = arith.constant 0 : i32
    %c0_i32_0 = arith.constant 0 : i32
    %c0_i32_1 = arith.constant 0 : i32
    return %c0_i32, %c0_i32_0 : i32, i32
  }
  func.func @transform_5(%arg0: i32) -> (i32, i32) {
    %c0_i32 = arith.constant 0 : i32
    %c0_i32_0 = arith.constant 0 : i32
    %c0_i32_1 = arith.constant 0 : i32
    return %c0_i32, %c0_i32_0 : i32, i32
  }
  func.func @transform_6(%arg0: i32) -> (i32, i32) {
    %c0_i32 = arith.constant 0 : i32
    %c0_i32_0 = arith.constant 0 : i32
    %c0_i32_1 = arith.constant 0 : i32
    return %c0_i32, %c0_i32_0 : i32, i32
  }
  func.func @transform_7(%arg0: i32) -> (i32, i32) {
    %c0_i32 = arith.constant 0 : i32
    %c0_i32_0 = arith.constant 0 : i32
    %c0_i32_1 = arith.constant 0 : i32
    return %c0_i32, %c0_i32_0 : i32, i32
  }
  func.func @transform_8(%arg0: i32) -> (i32, i32) {
    %c0_i32 = arith.constant 0 : i32
    %c0_i32_0 = arith.constant 0 : i32
    %c0_i32_1 = arith.constant 0 : i32
    return %c0_i32, %c0_i32_0 : i32, i32
  }
  func.func @transform_9(%arg0: i32) -> (i32, i32) {
    %c0_i32 = arith.constant 0 : i32
    %c0_i32_0 = arith.constant 0 : i32
    %c0_i32_1 = arith.constant 0 : i32
    return %c0_i32, %c0_i32_0 : i32, i32
  }
  func.func @transform_10(%arg0: i32) -> (i32, i32) {
    %c0_i32 = arith.constant 0 : i32
    %c0_i32_0 = arith.constant 0 : i32
    return %c0_i32, %arg0 : i32, i32
  }
}

</mosaic_0001>

<bundles_post_ra>
// kernel: tpu_custom_call.1
= control target key start
LH: loop header
LB: loop body
LE: loop exit
PB: predicated region body
PF: predicated region fallthrough
CT: control target
= control target key end

     0   :  { %s2897_s0 = inlined_call_operand.vmem [shape: f32[16,512], index: 0, kind: input, shape index: {}]   ;;  %s2898_s1 = inlined_call_operand.hbm [shape: f32[9,256], index: 1, kind: input, shape index: {}]   ;;  %s2899_s2 = inlined_call_operand.hbm [shape: bf16[16,144], index: 2, kind: input, shape index: {}]   ;;  %s2900_s3 = inlined_call_operand.vmem [shape: f32[16,1], index: 3, kind: input, shape index: {}]   ;;  %s2901_s4 = inlined_call_operand.vmem [shape: bf16[16,144], index: 4, kind: input, shape index: {}]   ;;  %s2902_s5 = inlined_call_operand.vmem [shape: f32[16,1], index: 5, kind: input, shape index: {}]   ;;  %s2903_s6 = inlined_call_operand.hbm [shape: bf16[16,144], index: 6, kind: input, shape index: {}]   ;;  %s2904_s7 = inlined_call_operand.vmem [shape: f32[16,1], index: 7, kind: input, shape index: {}]   ;;  %s2905_s8 = inlined_call_operand.vmem [shape: bf16[16,144], index: 8, kind: input, shape index: {}]   ;;  %s2906_s9 = inlined_call_operand.vmem [shape: f32[16,1], index: 9, kind: input, shape index: {}]   ;;  %s2907_s10 = inlined_call_operand.hbm [shape: f32[16,512], index: 10, kind: output, shape index: {}]  }
   0x1   :  { %2920 = sst [smem:[#allocation18_spill]] %s2899_s2 }
   0x2   :  { %2921 = sst [smem:[#allocation19_spill]] %s2907_s10 }
   0x3   :  { %15 = vsyncpa [#allocation4], 0 }
   0x4   :  { %16 = vsyncpa [#allocation7], 0 }
   0x5   :  { %17 = vsyncpa [#allocation5], 0 }
   0x6   :  { %19 = vsyncpa [#allocation5 + $0x1], 0  ;;  %s1894_s13 = smov 0   ;;  %s1896_s14 = smov 0  }
   0x7   :  { %s1898_s15 = smov 0   ;;  %s1900_s16 = smov 0  }
   0x8 LB: > { %2922 = sst [smem:[#allocation13_spill]] %s1806_s13  ;;  %s1915_s17 = sadd.s32 4294967295, %s1818_s16   ;;  %s1818_s16 = sphi %s1900_s16, %s2948_s16   ;;  %s1814_s15 = sphi %s1898_s15, %s2952_s15   ;;  %s1810_s14 = sphi %s1896_s14, %s2951_s14   ;;  %s1806_s13 = sphi %s1894_s13, %s2950_s13  }
   0x9   : > { %s1527_s18 = sadd.s32 4294967294, %s1818_s16   ;;  %s1919_s19 = sadd.s32 1, %s1818_s16  }
   0xa   : > { %2923 = sst [smem:[#allocation14_spill]] %s1919_s19  ;;  %s32_s20 = sadd.s32 1, %s1814_s15 }
   0xb   : > { %s29_s21 = ssub.s32 %s1818_s16, %s1919_s19  ;;  %p39_p0 = scmp.ne.s32.totalorder %s1814_s15, %s1810_s14 }
   0xc   : > { %p30_p1 = scmp.eq.s32.totalorder %s29_s21, 0  ;;  %p40_p2 = scmp.eq.s32.totalorder %s1818_s16, 0 }
   0xd   : > { %p258_p3 = scmp.eq.s32.totalorder %s1915_s17, 1  ;;  %p263_p4 = scmp.ne.s32.totalorder %s1810_s14, %s1806_s13 }
   0xe   : > { %s1931_s22 = scalar_select %p30_p1, %s1814_s15, %s32_s20  }
   0xf   : > { %p1933_p5 = por %p40_p2, %p39_p0  ;;  %p1937_p6 = por %p258_p3, %p39_p0 }
  0x10   : > { %2924 = sst [smem:[#allocation15_spill]] %s1931_s22  ;;  %p264_p7 = scmp.eq.s32.totalorder %s1527_s18, 1 }
  0x11   : > { %s2925_s23 = scalar_select %p1933_p5, 1, 0 }
  0x12   : > { %s2926_s24 = scalar_select %p1937_p6, 1, 0 }
  0x13   : > { %p1528_p8 = scmp.ge.s32.totalorder %s1818_s16, 1  ;;  %p271_p9 = scmp.lt.s32.totalorder %s1818_s16, 3 }
  0x14   : > { %2927 = sst [smem:[#allocation16_spill]] %s2926_s24  ;;  %p1943_p10 = por %p264_p7, %p263_p4 }
  0x15   : > { %p2910_p11 = scmp.eq.s32.totalorder %s1915_s17, 0  ;;  %p1948_p12 = pnand %p1528_p8, %p271_p9 }
  0x16   : > { %s2928_s25 = scalar_select %p1943_p10, 1, 0 }
  0x17   : > { %s2930_s26 = scalar_select %p1948_p12, 1, 0 }
  0x18   : > { %2929 = sst [smem:[#allocation17_spill]] %s2928_s25  ;;  %s1820_s27 = smov [#allocation6]  }
  0x19   : > { %s296_s28 = sshll.u32 %s1820_s27, 4  ;;  %p1577_p13 = pneg %p1948_p12  ;;  %s297_s28 = int_to_ptr.vmem [resolvable:$true] %s296_s28 }
  0x1a   : > { %s1821_s30 = smov [#allocation3]   ;;  %s2932_s2 = sld [smem:[#allocation18_spill]] }
  0x1b   : > { %p1956_p0 = pnand %p2910_p11, %p1577_p13  ;;  %s283_s11 = sshll.u32 %s1821_s30, 4  ;;  %s1960_s11 = int_to_ptr.vmem [resolvable:$true] %s283_s11 }
  0x1d   : > { %p1970_p2 = pneg %p1956_p0 }
  0x20   : > { %s1664_s20 = scalar_lea.hbm %s2932_s2, 256 }
  0x21   : > { %p1665_p1 = scmp.ne.s32.totalorder %s2932_s2, %s1664_s20  ;;  %p1671_p7 = scmp.lt.u32.totalorder %s1664_s20, %s2932_s2 }
  0x23   : > { %p1667_p3 = pnand %p1970_p2, %p1665_p1 }
  0x25   : > { %p1668_p4 = pneg %p1667_p3 }
  0x27   : > { %p1673_p8 = pnand %p1671_p7, %p1668_p4 }
  0x29   : > { %1676 = shalt.err (!%p1673_p8)
}
  0x2a   : > { %s1677_s12 = scalar_lea.vmem %s297_s28, 256  ;;  %p1685_p10 = scmp.lt.s32.totalorder %s297_s28, %s297_s28 }
  0x2b   : > { %p1678_p9 = scmp.ne.s32.totalorder %s297_s28, %s1677_s12  ;;  %p1686_p6 = scmp.lt.s32.totalorder %s1677_s12, %s1677_s12 }
  0x2d   : > { %p1680_p13 = pnand %p1678_p9, %p1970_p2  ;;  %p1687_p12 = por %p1686_p6, %p1685_p10 }
  0x2f   : > { %p1681_p11 = pneg %p1680_p13 }
  0x31   : > { %p1688_p5 = pnand %p1687_p12, %p1681_p11 }
  0x33   : > { %1691 = shalt.err (!%p1688_p5)
}
  0x34   : > { %s2918_s22 = smov 128   ;;  %s2919_s18 = smov 8  }
  0x35   : > { %1583 = dma.hbm_to_vmem [thread:$0]  (!%p1956_p0), %s2932_s2, 256, %s297_s28, [#allocation7], %s2918_s22, %s2918_s22, %s2919_s18  }
  0x36   : > { %s1692_s25 = scalar_lea.hbm %s2898_s1, 512 }
  0x37   : > { %p1693_p5 = scmp.ne.s32.totalorder %s2898_s1, %s1692_s25  ;;  %p1699_p11 = scmp.lt.u32.totalorder %s1692_s25, %s2898_s1 }
  0x39   : > { %p1695_p6 = pnand %p1693_p5, %p1970_p2 }
  0x3b   : > { %p1696_p10 = pneg %p1695_p6 }
  0x3d   : > { %p1701_p12 = pnand %p1699_p11, %p1696_p10 }
  0x3f   : > { %1704 = shalt.err (!%p1701_p12)
}
  0x40   : > { %s1705_s28 = scalar_lea.vmem %s1960_s11, 512  ;;  %p1713_p7 = scmp.lt.s32.totalorder %s1960_s11, %s1960_s11 }
  0x41   : > { %p1706_p1 = scmp.ne.s32.totalorder %s1960_s11, %s1705_s28  ;;  %p1714_p8 = scmp.lt.s32.totalorder %s1705_s28, %s1705_s28 }
  0x43   : > { %p1708_p3 = pnand %p1706_p1, %p1970_p2  ;;  %p1715_p9 = por %p1714_p8, %p1713_p7 }
  0x45   : > { %p1709_p4 = pneg %p1708_p3 }
  0x47   : > { %p1716_p13 = pnand %p1715_p9, %p1709_p4 }
  0x49   : > { %1719 = shalt.err (!%p1716_p13)
}
  0x4a   : > { %s1824_s13 = smov 256   ;;  %s1825_s10 = smov 16  }
  0x4b   : > { %1580 = dma.hbm_to_vmem [thread:$0]  (!%p1956_p0), %s2898_s1, 512, %s1960_s11, [#allocation4], %s1824_s13, %s1824_s13, %s1825_s10  }
  0x4c   : > { %s1826_s19 = smov [#allocation8]   ;;  %s1720_s12 = scalar_lea.hbm %s2903_s6, 256 }
  0x4d   : > { %s318_s20 = sshll.u32 %s1826_s19, 4  ;;  %p1721_p5 = scmp.ne.s32.totalorder %s2903_s6, %s1720_s12  ;;  %s319_s20 = int_to_ptr.vmem [resolvable:$true] %s318_s20 }
  0x4e   : > { %p1727_p11 = scmp.lt.u32.totalorder %s1720_s12, %s2903_s6 }
  0x4f   : > { %p1723_p6 = pnand %p1721_p5, %p1970_p2 }
  0x51   : > { %p1724_p10 = pneg %p1723_p6 }
  0x53   : > { %p1729_p12 = pnand %p1727_p11, %p1724_p10 }
  0x55   : > { %1732 = shalt.err (!%p1729_p12)
}
  0x56   : > { %s1733_s11 = scalar_lea.vmem %s319_s20, 256  ;;  %p1741_p7 = scmp.lt.s32.totalorder %s319_s20, %s319_s20 }
  0x57   : > { %p1734_p1 = scmp.ne.s32.totalorder %s319_s20, %s1733_s11  ;;  %p1742_p8 = scmp.lt.s32.totalorder %s1733_s11, %s1733_s11 }
  0x59   : > { %p1736_p3 = pnand %p1734_p1, %p1970_p2  ;;  %p1743_p9 = por %p1742_p8, %p1741_p7 }
  0x5b   : > { %p1737_p4 = pneg %p1736_p3 }
  0x5d   : > { %p1744_p13 = pnand %p1743_p9, %p1737_p4 }
  0x5f   : > { %1747 = shalt.err (!%p1744_p13)
}
  0x60   : > { %s2934_s22 = smov 8   ;;  %s2935_s13 = smov 128  }
  0x61   : > { %1586 = dma.hbm_to_vmem [thread:$0]  (!%p1956_p0), %s2903_s6, 256, %s319_s20, [#allocation7], %s2935_s13, %s2935_s13, %s2934_s22  }
  0x62   : > { %p1532_p5 = scmp.ge.s32.totalorder %s1818_s16, 2 }
  0x63   : > { %p2936_p2 = scmp.ne.s32.totalorder (!%p1532_p5), %s2925_s23, 0 }
  0x64   : > { %337 = sbr.rel (%p1532_p5) target bundleno = 114 (0x72), region = 52 }
  0x6b   : > { %340 = sbr.rel (!%p2936_p2) target bundleno = 114 (0x72), region = 56  ;;  %s342_s27 = sand.u32 (%p2936_p2), 1, %s1814_s15  }
  0x6c   : > { %s1561_s10 = sshll.u32 (%p2936_p2), %s1818_s16, 4  ;;  %s1533_s29 = sshll.u32 (%p2936_p2), %s342_s27, 5 }
  0x6d   : > { %s347_s19 = scalar_lea.vmem (%p2936_p2), %s2897_s0, %s1561_s10  ;;  %s344_s20 = scalar_lea.vmem (%p2936_p2), [#allocation2], %s1533_s29 }
  0x6e   : > { %v360_v0 = vld [vmem:[%s347_s19] sm:$0xff] (%p2936_p2)  ;;  %v362_v1 = vld [vmem:[%s347_s19 + $0x8] sm:$0xff] (%p2936_p2) }
  0x6f   : > { %v364_v2 = vld [vmem:[%s347_s19 + $0x20] sm:$0xff] (%p2936_p2)  ;;  %361 = vst [vmem:[%s344_s20] sm:$0xff] (%p2936_p2), %v360_v0  ;;  %363 = vst [vmem:[%s344_s20 + $0x8] sm:$0xff] (%p2936_p2), %v362_v1  ;;  %v366_v3 = vld [vmem:[%s347_s19 + $0x28] sm:$0xff] (%p2936_p2) }
  0x70   : > { %365 = vst [vmem:[%s344_s20 + $0x10] sm:$0xff] (%p2936_p2), %v364_v2  ;;  %367 = vst [vmem:[%s344_s20 + $0x18] sm:$0xff] (%p2936_p2), %v366_v3 }
  0x72 PF: > { %p2937_p0 = scmp.ne.s32.totalorder %s2930_s26, 0 }
  0x73   : > { %s379_s23 = sand.u32 (!%p2937_p0), 1, %s1810_s14   ;;  %p2938_p6 = scmp.eq.s32.totalorder (!%p2937_p0), %s1915_s17, 0 }
  0x74   : > { %376 = sbr.rel (%p2937_p0) target bundleno = 1750 (0x6d6), region = 79  ;;  %s2048_s21 = sshll.u32 (!%p2937_p0), %s379_s23, 5 }
  0x75   : > { %s381_s30 = scalar_lea.vmem (!%p2937_p0), [#allocation2], %s2048_s21 }
  0x7b   : > { %1793 = dma.done.wait (%p2938_p6), [#allocation4], 512   ;;  %p2939_p10 = pmov %p2938_p6 }
  0x7c   : > { %p2940_p11 = pmov %p2938_p6 }
  0x7d   : > { %1795 = vsyncadd (%p2939_p10), [#allocation4], 4294966784 }
  0x7e   : > { %1797 = dma.done.wait (%p2940_p11), [#allocation7], 512   ;;  %p2941_p12 = pmov %p2938_p6 }
  0x7f   : > { %v436_v4 = vld [vmem:[%s381_s30 + $0x8] sm:$0xff]  ;;  %v435_v5 = vld [vmem:[%s381_s30] sm:$0xff]  ;;  %s1827_s26 = smov 17   ;;  %v438_v6 = vld [vmem:[%s381_s30 + $0x18] sm:$0xff]  ;;  %s1828_s12 = smov 16   ;;  %v451_v8 = vlaneseq  ;;  %vm694_vm0 = vcmask 130048  }
  0x80   : > { %1799 = vsyncadd (%p2941_p12), [#allocation7], 4294966784  ;;  %447 = vrot.lane.b32.xlu1 %v436_v4, %s1827_s26  ;;  %443 = vrot.lane.b32.xlu0 %v435_v5, %s1827_s26  ;;  %v437_v7 = vld [vmem:[%s381_s30 + $0x10] sm:$0xff]  ;;  %s1829_s28 = smov 15   ;;  %v2072_v11 = vld [vmem:[#allocation3 + $0x8] sm:$0xff]  ;;  %s1830_s11 = smov 1  }
  0x81   : > { %v2067_v9 = vshrl.u32 %v451_v8, 7  ;;  %v2074_v12 = vld [vmem:[#allocation3] sm:$0xff]  ;;  %s1831_s22 = smov 127   ;;  %s1832_s13 = smov 113   ;;  %v1835_v22 = vmov 0   ;;  %v442_v24 = vld [vmem:[%s2900_s3 + $0x8] sm:$0xff] }
  0x82   : > { %s1833_s2 = smov 112   ;;  %v1652_v21 = vld [vmem:[#allocation6 + $0x4] ss:$8 sps:$4 sm:$0xff]   ;;  %s1834_s18 = smov 111   ;;  %1648 = vset.pattern.permute.xlu0 %v1835_v22  ;;  %1649 = vset.pattern.permute.xlu1 %v1835_v22  ;;  %v2127_v25 = vand.u32 127, %v451_v8 }
  0x83   : > { %v555_v10 = vsub.s32 4, %v2067_v9  ;;  %1546 = vmatprep.mubr.msk.bf16.mxu0 %vm694_vm0, %v1652_v21  ;;  %v441_v23 = vld [vmem:[%s2900_s3] sm:$0xff]  ;;  %v460_v26 = vsub.s32 0, %v2067_v9  ;;  %v487_v37 = vsub.s32 1, %v2067_v9  ;;  %v514_v50 = vsub.s32 2, %v2067_v9  ;;  %s427_s10 = scalar_lea.vmem [#allocation9], %s2048_s21 }
  0x84   : > { %449 = vrot.lane.b32.xlu1 %v438_v6, %s1827_s26  ;;  %445 = vrot.lane.b32.xlu0 %v437_v7, %s1827_s26  ;;  %vm453_vm1 = vcmp.lt.s32.totalorder %v2127_v25, 17  ;;  %vm480_vm2 = vcmp.lt.s32.totalorder %v2127_v25, 16  ;;  %vm507_vm3 = vcmp.lt.s32.totalorder %v2127_v25, 15  ;;  %v541_v3 = vsub.s32 3, %v2067_v9  ;;  %s1428_s29 = sshll.u32 %s427_s10, 4  ;;  %s1562_s24 = sshll.u32 %s1915_s17, 8  ;;  %s2845_s29 = int_to_ptr.vmem [resolvable:$true] %s1428_s29 }
  0x85   : > { %v2077_v13 = vrot.slane %v2072_v11, %v555_v10  ;;  %v2080_v14 = vrot.slane %v2074_v12, %v555_v10  ;;  %v2132_v29 = vrot.slane %v2072_v11, %v460_v26  ;;  %v2135_v30 = vrot.slane %v2074_v12, %v460_v26  ;;  %s2942_s25 = sld [smem:[#allocation16_spill]]  ;;  %s2943_s20 = sld [smem:[#allocation19_spill]] }
  0x86   : > { %v2152_v46 = vrot.slane %v2074_v12, %v487_v37  ;;  %v2155_v47 = vrot.slane %v2072_v11, %v487_v37  ;;  %v2172_v63 = vrot.slane %v2074_v12, %v514_v50  ;;  %v2175_v0 = vrot.slane %v2072_v11, %v514_v50  ;;  %s2854_s17 = scalar_lea.sflag [#allocation5], %s379_s23  ;;  %s1836_s27 = smov [#allocation9]  }
  0x87   : > { %v2085_v15 = vmul.f32 %v2077_v13, %v436_v4  ;;  %v2088_v16 = vmul.f32 %v2077_v13, %v438_v6  ;;  %v2091_v17 = vmul.f32 %v2080_v14, %v435_v5  ;;  %v2094_v18 = vmul.f32 %v2080_v14, %v437_v7 }
  0x88   : > { %474 = vrot.lane.b32.xlu1 %v437_v7, %s1828_s12  ;;  %472 = vrot.lane.b32.xlu0 %v435_v5, %s1828_s12  ;;  %vm534_vm4 = vcmp.lt.s32.totalorder %v2127_v25, 1  ;;  %vm575_vm5 = vcmp.lt.s32.totalorder %v2127_v25, 127  ;;  %vm602_vm6 = vcmp.lt.s32.totalorder %v2127_v25, 113  ;;  %vm629_vm7 = vcmp.lt.s32.totalorder %v2127_v25, 112 }
  0x89   : > { %v566_v19 = vpack.c.bf16 %v2088_v16, %v2085_v15  ;;  %v565_v20 = vpack.c.bf16 %v2094_v18, %v2091_v17  ;;  %vm656_vm8 = vcmp.lt.s32.totalorder %v2127_v25, 111 }
  0x8b   : > { %s2850_s30 = scalar_lea.hbm %s2943_s20, %s1562_s24  ;;  %p2944_p3 = scmp.ne.s32.totalorder %s2942_s25, 0 }
  0x8c   : > { %478 = vrot.lane.b32.xlu1 %v438_v6, %s1828_s12  ;;  %476 = vrot.lane.b32.xlu0 %v436_v4, %s1828_s12 }
  0x90   : > { %501 = vrot.lane.b32.xlu1 %v437_v7, %s1829_s28  ;;  %499 = vrot.lane.b32.xlu0 %v435_v5, %s1829_s28 }
  0x94   : > { %505 = vrot.lane.b32.xlu1 %v438_v6, %s1829_s28  ;;  %503 = vrot.lane.b32.xlu0 %v436_v4, %s1829_s28 }
  0x98   : > { %528 = vrot.lane.b32.xlu1 %v437_v7, %s1830_s11  ;;  %526 = vrot.lane.b32.xlu0 %v435_v5, %s1830_s11 }
  0x9c   : > { %532 = vrot.lane.b32.xlu1 %v438_v6, %s1830_s11  ;;  %530 = vrot.lane.b32.xlu0 %v436_v4, %s1830_s11 }
  0xa0   : > { %569 = vrot.lane.b32.xlu1 %v437_v7, %s1831_s22  ;;  %567 = vrot.lane.b32.xlu0 %v435_v5, %s1831_s22 }
  0xa4   : > { %573 = vrot.lane.b32.xlu1 %v438_v6, %s1831_s22  ;;  %571 = vrot.lane.b32.xlu0 %v436_v4, %s1831_s22 }
  0xa8   : > { %596 = vrot.lane.b32.xlu1 %v437_v7, %s1832_s13  ;;  %594 = vrot.lane.b32.xlu0 %v435_v5, %s1832_s13 }
  0xac   : > { %600 = vrot.lane.b32.xlu1 %v438_v6, %s1832_s13  ;;  %598 = vrot.lane.b32.xlu0 %v436_v4, %s1832_s13 }
  0xb0   : > { %623 = vrot.lane.b32.xlu1 %v437_v7, %s1833_s2  ;;  %621 = vrot.lane.b32.xlu0 %v435_v5, %s1833_s2 }
  0xb4   : > { %627 = vrot.lane.b32.xlu1 %v438_v6, %s1833_s2  ;;  %625 = vrot.lane.b32.xlu0 %v436_v4, %s1833_s2 }
  0xb8   : > { %650 = vrot.lane.b32.xlu1 %v437_v7, %s1834_s18  ;;  %648 = vrot.lane.b32.xlu0 %v435_v5, %s1834_s18 }
  0xbc   : > { %654 = vrot.lane.b32.xlu1 %v438_v6, %s1834_s18  ;;  %652 = vrot.lane.b32.xlu0 %v436_v4, %s1834_s18 }
  0xc0   : > { %677 = vperm.xlu0 %1648, %v441_v23   ;;  %682 = vperm.xlu1 %1649, %v442_v24  }
  0xf2   : > { %v448_v27 = vpop.permute.xlu1 %447  ;;  %v444_v28 = vpop.permute.xlu0 %443 }
  0xf3   : > { %v456_v31 = vsel %vm453_vm1, %v448_v27, %v444_v28  ;;  %v454_v32 = vsel %vm453_vm1, %v444_v28, %v448_v27  ;;  %v2192_v28 = vrot.slane %v2074_v12, %v541_v3 }
  0xf4   : > { %v467_v38 = vmul.f32 %v2132_v29, %v454_v32  ;;  %v466_v40 = vmul.f32 %v2135_v30, %v456_v31  ;;  %v2195_v31 = vrot.slane %v2072_v11, %v541_v3 }
  0xf6   : > { %v450_v33 = vpop.permute.xlu1 %449  ;;  %v446_v34 = vpop.permute.xlu0 %445 }
  0xf7   : > { %v457_v35 = vsel %vm453_vm1, %v450_v33, %v446_v34  ;;  %v455_v36 = vsel %vm453_vm1, %v446_v34, %v450_v33  ;;  %v582_v34 = vsub.s32 5, %v2067_v9 }
  0xf8   : > { %v469_v39 = vmul.f32 %v2132_v29, %v455_v36  ;;  %v468_v41 = vmul.f32 %v2135_v30, %v457_v35 }
  0xf9   : > { %v2215_v50 = vrot.slane %v2072_v11, %v582_v34 }
  0xfa   : > { %v475_v42 = vpop.permute.xlu1 %474  ;;  %v473_v43 = vpop.permute.xlu0 %472  ;;  %v471_v44 = vpack.c.bf16 %v469_v39, %v467_v38  ;;  %v470_v45 = vpack.c.bf16 %v468_v41, %v466_v40 }
  0xfc   : > { %698 = vmatprep.subr.bf16.mxu0 %v471_v44 }
  0xfd   : > { %699 = vmatpush1.bf16.msra.mxu0 %v470_v45 }
  0xfe   : > { %v479_v48 = vpop.permute.xlu1 %478  ;;  %v477_v49 = vpop.permute.xlu0 %476 }
  0xff   : > { %v482_v51 = vsel %vm480_vm2, %v475_v42, %v479_v48  ;;  %v484_v52 = vsel %vm480_vm2, %v479_v48, %v475_v42  ;;  %v481_v53 = vsel %vm480_vm2, %v473_v43, %v477_v49  ;;  %v483_v54 = vsel %vm480_vm2, %v477_v49, %v473_v43 }
 0x100   : > { %v495_v55 = vmul.f32 %v2152_v46, %v484_v52  ;;  %v496_v56 = vmul.f32 %v2155_v47, %v482_v51  ;;  %v493_v57 = vmul.f32 %v2152_v46, %v483_v54  ;;  %v494_v58 = vmul.f32 %v2155_v47, %v481_v53 }
 0x101   : > { %v2212_v49 = vrot.slane %v2074_v12, %v582_v34  ;;  %v609_v53 = vsub.s32 6, %v2067_v9 }
 0x102   : > { %v502_v59 = vpop.permute.xlu1 %501  ;;  %v500_v60 = vpop.permute.xlu0 %499  ;;  %v498_v61 = vpack.c.bf16 %v496_v56, %v494_v58  ;;  %v497_v62 = vpack.c.bf16 %v495_v55, %v493_v57 }
 0x104   : > { %700 = vmatprep.subr.bf16.mxu0 %v498_v61 }
 0x105   : > { %701 = vmatpush1.bf16.msra.mxu0 %v497_v62 }
 0x106   : > { %v506_v1 = vpop.permute.xlu1 %505  ;;  %v504_v2 = vpop.permute.xlu0 %503 }
 0x107   : > { %v509_v4 = vsel %vm507_vm3, %v502_v59, %v506_v1  ;;  %v511_v5 = vsel %vm507_vm3, %v506_v1, %v502_v59  ;;  %v508_v6 = vsel %vm507_vm3, %v500_v60, %v504_v2  ;;  %v510_v7 = vsel %vm507_vm3, %v504_v2, %v500_v60 }
 0x108   : > { %v522_v8 = vmul.f32 %v2172_v63, %v511_v5  ;;  %v523_v10 = vmul.f32 %v2175_v0, %v509_v4  ;;  %v520_v21 = vmul.f32 %v2172_v63, %v510_v7  ;;  %v521_v22 = vmul.f32 %v2175_v0, %v508_v6 }
 0x109   : > { %v2238_v1 = vrot.slane %v2074_v12, %v609_v53  ;;  %v2241_v2 = vrot.slane %v2072_v11, %v609_v53  ;;  %v636_v5 = vsub.s32 7, %v2067_v9 }
 0x10a   : > { %v529_v23 = vpop.permute.xlu1 %528  ;;  %v527_v24 = vpop.permute.xlu0 %526  ;;  %v525_v26 = vpack.c.bf16 %v523_v10, %v521_v22  ;;  %v524_v27 = vpack.c.bf16 %v522_v8, %v520_v21 }
 0x10c   : > { %702 = vmatprep.subr.bf16.mxu0 %v525_v26  ;;  %v2258_v26 = vrot.slane %v2074_v12, %v636_v5 }
 0x10d   : > { %703 = vmatpush1.bf16.msra.mxu0 %v524_v27  ;;  %v2261_v27 = vrot.slane %v2072_v11, %v636_v5 }
 0x10e   : > { %v533_v32 = vpop.permute.xlu1 %532  ;;  %v531_v33 = vpop.permute.xlu0 %530 }
 0x10f   : > { %v536_v35 = vsel %vm534_vm4, %v529_v23, %v533_v32  ;;  %v538_v36 = vsel %vm534_vm4, %v533_v32, %v529_v23  ;;  %v535_v37 = vsel %vm534_vm4, %v527_v24, %v531_v33  ;;  %v537_v38 = vsel %vm534_vm4, %v531_v33, %v527_v24 }
 0x110   : > { %v549_v39 = vmul.f32 %v2192_v28, %v538_v36  ;;  %v550_v40 = vmul.f32 %v2195_v31, %v536_v35  ;;  %v547_v41 = vmul.f32 %v2192_v28, %v537_v38  ;;  %v548_v42 = vmul.f32 %v2195_v31, %v535_v37 }
 0x112   : > { %v570_v43 = vpop.permute.xlu1 %569  ;;  %v568_v44 = vpop.permute.xlu0 %567  ;;  %v552_v45 = vpack.c.bf16 %v550_v40, %v548_v42  ;;  %v551_v48 = vpack.c.bf16 %v549_v39, %v547_v41 }
 0x114   : > { %704 = vmatprep.subr.bf16.mxu0 %v552_v45  ;;  %v2278_v45 = vld [vmem:[#allocation3 + $0x18] ss:$0 sm:$0xff] }
 0x115   : > { %705 = vmatpush1.bf16.msra.mxu0 %v551_v48 }
 0x116   : > { %v574_v51 = vpop.permute.xlu1 %573  ;;  %v572_v52 = vpop.permute.xlu0 %571  ;;  %706 = vmatprep.subr.bf16.mxu0 %v566_v19 }
 0x117   : > { %v577_v54 = vsel %vm575_vm5, %v570_v43, %v574_v51  ;;  %v579_v55 = vsel %vm575_vm5, %v574_v51, %v570_v43  ;;  %v576_v56 = vsel %vm575_vm5, %v568_v44, %v572_v52  ;;  %v578_v57 = vsel %vm575_vm5, %v572_v52, %v568_v44  ;;  %v2276_v44 = vld [vmem:[#allocation3 + $0x10] ss:$0 sm:$0xff] }
 0x118   : > { %v590_v58 = vmul.f32 %v2212_v49, %v577_v54  ;;  %v591_v59 = vmul.f32 %v2215_v50, %v579_v55  ;;  %v588_v15 = vmul.f32 %v2212_v49, %v576_v56  ;;  %v589_v16 = vmul.f32 %v2215_v50, %v578_v57 }
 0x119   : > { %707 = vmatpush1.bf16.msra.mxu0 %v565_v20 }
 0x11a   : > { %v597_v19 = vpop.permute.xlu1 %596  ;;  %v595_v60 = vpop.permute.xlu0 %594  ;;  %v593_v61 = vpack.c.bf16 %v591_v59, %v589_v16  ;;  %v592_v62 = vpack.c.bf16 %v590_v58, %v588_v15 }
 0x11c   : > { %708 = vmatprep.subr.bf16.mxu0 %v593_v61 }
 0x11d   : > { %709 = vmatpush1.bf16.msra.mxu0 %v592_v62 }
 0x11e   : > { %v601_v3 = vpop.permute.xlu1 %600  ;;  %v599_v4 = vpop.permute.xlu0 %598 }
 0x11f   : > { %v604_v17 = vsel %vm602_vm6, %v597_v19, %v601_v3  ;;  %v606_v18 = vsel %vm602_vm6, %v601_v3, %v597_v19  ;;  %v603_v20 = vsel %vm602_vm6, %v595_v60, %v599_v4  ;;  %v605_v6 = vsel %vm602_vm6, %v599_v4, %v595_v60  ;;  %v1650_v19 = vld [vmem:[#allocation6] ss:$8 sps:$4 sm:$0xff]  }
 0x120   : > { %v617_v7 = vmul.f32 %v2238_v1, %v604_v17  ;;  %v618_v8 = vmul.f32 %v2241_v2, %v606_v18  ;;  %v615_v10 = vmul.f32 %v2238_v1, %v603_v20  ;;  %v616_v9 = vmul.f32 %v2241_v2, %v605_v6 }
 0x122   : > { %v624_v21 = vpop.permute.xlu1 %623  ;;  %v622_v22 = vpop.permute.xlu0 %621  ;;  %v620_v23 = vpack.c.bf16 %v618_v8, %v616_v9  ;;  %v619_v24 = vpack.c.bf16 %v617_v7, %v615_v10 }
 0x124   : > { %710 = vmatprep.subr.bf16.mxu0 %v620_v23 }
 0x125   : > { %711 = vmatpush1.bf16.msra.mxu0 %v619_v24 }
 0x126   : > { %v628_v32 = vpop.permute.xlu1 %627  ;;  %v626_v33 = vpop.permute.xlu0 %625 }
 0x127   : > { %v631_v34 = vsel %vm629_vm7, %v624_v21, %v628_v32  ;;  %v633_v35 = vsel %vm629_vm7, %v628_v32, %v624_v21  ;;  %v630_v36 = vsel %vm629_vm7, %v622_v22, %v626_v33  ;;  %v632_v37 = vsel %vm629_vm7, %v626_v33, %v622_v22 }
 0x128   : > { %v644_v12 = vmul.f32 %v2258_v26, %v631_v34  ;;  %v645_v11 = vmul.f32 %v2261_v27, %v633_v35  ;;  %v642_v38 = vmul.f32 %v2258_v26, %v630_v36  ;;  %v643_v39 = vmul.f32 %v2261_v27, %v632_v37  ;;  %v1655_v34 = vld [vmem:[%s2901_s4 + $0x4] ss:$8 sps:$4 sm:$0xff]  }
 0x129   : > { %1549 = vmatprep.mubr.msk.bf16.mxu1 %vm694_vm0, %v1655_v34  ;;  %v747_v35 = vld [vmem:[%s2902_s5] sm:$0xff]  ;;  %v748_v36 = vld [vmem:[%s2902_s5 + $0x8] sm:$0xff] }
 0x12a   : > { %v651_v40 = vpop.permute.xlu1 %650  ;;  %v649_v41 = vpop.permute.xlu0 %648  ;;  %v647_v42 = vpack.c.bf16 %v645_v11, %v643_v39  ;;  %v646_v43 = vpack.c.bf16 %v644_v12, %v642_v38 }
 0x12c   : > { %712 = vmatprep.subr.bf16.mxu0 %v647_v42 }
 0x12d   : > { %713 = vmatpush1.bf16.msra.mxu0 %v646_v43 }
 0x12e   : > { %v655_v48 = vpop.permute.xlu1 %654  ;;  %v653_v51 = vpop.permute.xlu0 %652 }
 0x12f   : > { %v658_v52 = vsel %vm656_vm8, %v651_v40, %v655_v48  ;;  %v660_v53 = vsel %vm656_vm8, %v655_v48, %v651_v40  ;;  %v657_v54 = vsel %vm656_vm8, %v649_v41, %v653_v51  ;;  %v659_v55 = vsel %vm656_vm8, %v653_v51, %v649_v41 }
 0x130   : > { %v671_v56 = vmul.f32 %v2276_v44, %v658_v52  ;;  %v672_v57 = vmul.f32 %v2278_v45, %v660_v53  ;;  %v669_v58 = vmul.f32 %v2276_v44, %v657_v54  ;;  %v670_v59 = vmul.f32 %v2278_v45, %v659_v55 }
 0x132   : > { %v674_v15 = vpack.c.bf16 %v672_v57, %v670_v59  ;;  %v673_v16 = vpack.c.bf16 %v671_v56, %v669_v58 }
 0x134   : > { %714 = vmatprep.subr.bf16.mxu0 %v674_v15 }
 0x135   : > { %715 = vmatpush1.bf16.msra.mxu0 %v673_v16 }
 0x138   : > { %731 = vmatmul.mubr.bf16.vlgmr.msra.gmra.mrb[0].mxu0 %v1650_v19 }
 0x13f   : > { %v678_v60 = vpop.permute.xlu0 %677  ;;  %v683_v62 = vpop.permute.xlu1 %682 }
 0x20b   : > { %v732_v61 = vpop.f32.mrb[0].mxu0 }
 0x20c   : > { %v733_v3 = vadd.f32 %v732_v61, %v678_v60  ;;  %v734_v4 = vpop.f32.mrb[1].mxu0 }
 0x20d   : > { %v735_v5 = vadd.f32 %v734_v4, %v678_v60  ;;  %v736_v17 = vpop.f32.mrb[2].mxu0 }
 0x20e   : > { %v741_v18 = vmax.f32 %v733_v3, 0.0  ;;  %v737_v20 = vadd.f32 %v736_v17, %v683_v62  ;;  %v738_v6 = vpop.f32.mrb[3].mxu0 }
 0x20f   : > { %v742_v7 = vmax.f32 %v735_v5, 0.0  ;;  %v739_v8 = vadd.f32 %v738_v6, %v683_v62 }
 0x210   : > { %v743_v10 = vmax.f32 %v737_v20, 0.0  ;;  %749 = vrot.lane.b32.xlu1 %v741_v18, %s1827_s26  ;;  %v2295_v21 = vmul.f32 %v741_v18, %v2080_v14 }
 0x211   : > { %v744_v9 = vmax.f32 %v739_v8, 0.0  ;;  %v2301_v23 = vmul.f32 %v742_v7, %v2077_v13 }
 0x212   : > { %751 = vrot.lane.b32.xlu0 %v743_v10, %s1827_s26  ;;  %v2298_v22 = vmul.f32 %v743_v10, %v2080_v14 }
 0x213   : > { %v2304_v24 = vmul.f32 %v744_v9, %v2077_v13 }
 0x214   : > { %767 = vrot.lane.b32.xlu1 %v741_v18, %s1828_s12  ;;  %v825_v32 = vpack.c.bf16 %v2298_v22, %v2295_v21 }
 0x215   : > { %v826_v33 = vpack.c.bf16 %v2304_v24, %v2301_v23 }
 0x216   : > { %769 = vrot.lane.b32.xlu0 %v743_v10, %s1828_s12 }
 0x218   : > { %785 = vrot.lane.b32.xlu1 %v741_v18, %s1829_s28 }
 0x21a   : > { %787 = vrot.lane.b32.xlu0 %v743_v10, %s1829_s28 }
 0x21c   : > { %803 = vrot.lane.b32.xlu1 %v741_v18, %s1830_s11 }
 0x21e   : > { %805 = vrot.lane.b32.xlu0 %v743_v10, %s1830_s11 }
 0x220   : > { %827 = vrot.lane.b32.xlu1 %v741_v18, %s1831_s22 }
 0x222   : > { %829 = vrot.lane.b32.xlu0 %v743_v10, %s1831_s22 }
 0x224   : > { %845 = vrot.lane.b32.xlu1 %v741_v18, %s1832_s13 }
 0x226   : > { %847 = vrot.lane.b32.xlu0 %v743_v10, %s1832_s13 }
 0x228   : > { %863 = vrot.lane.b32.xlu1 %v741_v18, %s1833_s2 }
 0x22a   : > { %865 = vrot.lane.b32.xlu0 %v743_v10, %s1833_s2 }
 0x22c   : > { %753 = vrot.lane.b32.xlu1 %v742_v7, %s1827_s26 }
 0x22e   : > { %755 = vrot.lane.b32.xlu0 %v744_v9, %s1827_s26 }
 0x230   : > { %771 = vrot.lane.b32.xlu1 %v742_v7, %s1828_s12 }
 0x232   : > { %773 = vrot.lane.b32.xlu0 %v744_v9, %s1828_s12 }
 0x234   : > { %789 = vrot.lane.b32.xlu1 %v742_v7, %s1829_s28 }
 0x236   : > { %791 = vrot.lane.b32.xlu0 %v744_v9, %s1829_s28 }
 0x238   : > { %807 = vrot.lane.b32.xlu1 %v742_v7, %s1830_s11 }
 0x23a   : > { %809 = vrot.lane.b32.xlu0 %v744_v9, %s1830_s11 }
 0x23c   : > { %881 = vrot.lane.b32.xlu1 %v741_v18, %s1834_s18 }
 0x23e   : > { %883 = vrot.lane.b32.xlu0 %v743_v10, %s1834_s18 }
 0x240   : > { %831 = vrot.lane.b32.xlu1 %v742_v7, %s1831_s22 }
 0x242   : > { %833 = vrot.lane.b32.xlu0 %v744_v9, %s1831_s22 }
 0x244   : > { %849 = vrot.lane.b32.xlu1 %v742_v7, %s1832_s13 }
 0x246   : > { %851 = vrot.lane.b32.xlu0 %v744_v9, %s1832_s13 }
 0x248   : > { %867 = vrot.lane.b32.xlu1 %v742_v7, %s1833_s2 }
 0x24a   : > { %869 = vrot.lane.b32.xlu0 %v744_v9, %s1833_s2 }
 0x24c   : > { %885 = vrot.lane.b32.xlu1 %v742_v7, %s1834_s18 }
 0x24e   : > { %887 = vrot.lane.b32.xlu0 %v744_v9, %s1834_s18 }
 0x250   : > { %901 = vperm.xlu1 %1649, %v747_v35  }
 0x252   : > { %906 = vperm.xlu0 %1648, %v748_v36  }
 0x282   : > { %v750_v37 = vpop.permute.xlu1 %749 }
 0x284   : > { %v752_v12 = vpop.permute.xlu0 %751 }
 0x286   : > { %v768_v11 = vpop.permute.xlu1 %767 }
 0x288   : > { %v770_v38 = vpop.permute.xlu0 %769 }
 0x28a   : > { %v786_v39 = vpop.permute.xlu1 %785 }
 0x28c   : > { %v788_v40 = vpop.permute.xlu0 %787 }
 0x28e   : > { %v804_v41 = vpop.permute.xlu1 %803 }
 0x290   : > { %v806_v42 = vpop.permute.xlu0 %805 }
 0x292   : > { %v2350_v43 = vpop.permute.xlu1 %827 }
 0x294   : > { %v2352_v48 = vpop.permute.xlu0 %829 }
 0x296   : > { %v2354_v51 = vpop.permute.xlu1 %845 }
 0x298   : > { %v2356_v52 = vpop.permute.xlu0 %847 }
 0x29a   : > { %v2358_v53 = vpop.permute.xlu1 %863 }
 0x29c   : > { %v2360_v54 = vpop.permute.xlu0 %865 }
 0x29e   : > { %v754_v55 = vpop.permute.xlu1 %753 }
 0x29f   : > { %v757_v56 = vsel %vm453_vm1, %v750_v37, %v754_v55  ;;  %v759_v57 = vsel %vm453_vm1, %v754_v55, %v750_v37 }
 0x2a0   : > { %v756_v58 = vpop.permute.xlu0 %755  ;;  %v761_v16 = vmul.f32 %v759_v57, %v2135_v30  ;;  %v762_v61 = vmul.f32 %v757_v56, %v2132_v29 }
 0x2a1   : > { %v758_v59 = vsel %vm453_vm1, %v752_v12, %v756_v58  ;;  %v760_v15 = vsel %vm453_vm1, %v756_v58, %v752_v12 }
 0x2a2   : > { %v763_v19 = vmul.f32 %v760_v15, %v2135_v30  ;;  %v772_v60 = vpop.permute.xlu1 %771  ;;  %v764_v62 = vmul.f32 %v758_v59, %v2132_v29 }
 0x2a3   : > { %v775_v3 = vsel %vm480_vm2, %v768_v11, %v772_v60  ;;  %v777_v4 = vsel %vm480_vm2, %v772_v60, %v768_v11 }
 0x2a4   : > { %v774_v5 = vpop.permute.xlu0 %773  ;;  %v766_v17 = vpack.c.bf16 %v764_v62, %v762_v61  ;;  %v765_v18 = vpack.c.bf16 %v763_v19, %v761_v16  ;;  %v779_v7 = vmul.f32 %v777_v4, %v2152_v46  ;;  %v780_v8 = vmul.f32 %v775_v3, %v2155_v47 }
 0x2a5   : > { %v776_v20 = vsel %vm480_vm2, %v770_v38, %v774_v5  ;;  %v778_v6 = vsel %vm480_vm2, %v774_v5, %v770_v38 }
 0x2a6   : > { %v781_v10 = vmul.f32 %v778_v6, %v2152_v46  ;;  %v782_v9 = vmul.f32 %v776_v20, %v2155_v47  ;;  %921 = vmatprep.subr.bf16.mxu1 %v766_v17  ;;  %v790_v34 = vpop.permute.xlu1 %789 }
 0x2a7   : > { %v793_v35 = vsel %vm507_vm3, %v786_v39, %v790_v34  ;;  %v795_v36 = vsel %vm507_vm3, %v790_v34, %v786_v39  ;;  %922 = vmatpush1.bf16.msra.mxu1 %v765_v18 }
 0x2a8   : > { %v792_v37 = vpop.permute.xlu0 %791  ;;  %v784_v12 = vpack.c.bf16 %v782_v9, %v780_v8  ;;  %v783_v11 = vpack.c.bf16 %v781_v10, %v779_v7  ;;  %v797_v56 = vmul.f32 %v795_v36, %v2172_v63  ;;  %v798_v57 = vmul.f32 %v793_v35, %v2175_v0 }
 0x2a9   : > { %v794_v38 = vsel %vm507_vm3, %v788_v40, %v792_v37  ;;  %v796_v55 = vsel %vm507_vm3, %v792_v37, %v788_v40 }
 0x2aa   : > { %v799_v58 = vmul.f32 %v796_v55, %v2172_v63  ;;  %v800_v59 = vmul.f32 %v794_v38, %v2175_v0  ;;  %923 = vmatprep.subr.bf16.mxu1 %v784_v12  ;;  %v808_v39 = vpop.permute.xlu1 %807 }
 0x2ab   : > { %v811_v15 = vsel %vm534_vm4, %v804_v41, %v808_v39  ;;  %v813_v16 = vsel %vm534_vm4, %v808_v39, %v804_v41  ;;  %924 = vmatpush1.bf16.msra.mxu1 %v783_v11 }
 0x2ac   : > { %v810_v19 = vpop.permute.xlu0 %809  ;;  %v802_v60 = vpack.c.bf16 %v800_v59, %v798_v57  ;;  %v801_v40 = vpack.c.bf16 %v799_v58, %v797_v56  ;;  %v815_v3 = vmul.f32 %v813_v16, %v2192_v28  ;;  %v816_v4 = vmul.f32 %v811_v15, %v2195_v31 }
 0x2ad   : > { %v812_v61 = vsel %vm534_vm4, %v806_v42, %v810_v19  ;;  %v814_v62 = vsel %vm534_vm4, %v810_v19, %v806_v42 }
 0x2ae   : > { %v817_v5 = vmul.f32 %v814_v62, %v2192_v28  ;;  %v818_v17 = vmul.f32 %v812_v61, %v2195_v31  ;;  %925 = vmatprep.subr.bf16.mxu1 %v802_v60  ;;  %v882_v41 = vpop.permute.xlu1 %881 }
 0x2af   : > { %926 = vmatpush1.bf16.msra.mxu1 %v801_v40 }
 0x2b0   : > { %v884_v18 = vpop.permute.xlu0 %883  ;;  %v820_v20 = vpack.c.bf16 %v818_v17, %v816_v4  ;;  %v819_v6 = vpack.c.bf16 %v817_v5, %v815_v3 }
 0x2b2   : > { %927 = vmatprep.subr.bf16.mxu1 %v820_v20  ;;  %v832_v7 = vpop.permute.xlu1 %831 }
 0x2b3   : > { %v835_v42 = vsel %vm575_vm5, %v2350_v43, %v832_v7  ;;  %v837_v8 = vsel %vm575_vm5, %v832_v7, %v2350_v43  ;;  %928 = vmatpush1.bf16.msra.mxu1 %v819_v6 }
 0x2b4   : > { %v834_v10 = vpop.permute.xlu0 %833  ;;  %929 = vmatprep.subr.bf16.mxu1 %v826_v33  ;;  %v839_v35 = vmul.f32 %v835_v42, %v2212_v49  ;;  %v840_v36 = vmul.f32 %v837_v8, %v2215_v50 }
 0x2b5   : > { %v836_v9 = vsel %vm575_vm5, %v2352_v48, %v834_v10  ;;  %v838_v34 = vsel %vm575_vm5, %v834_v10, %v2352_v48 }
 0x2b6   : > { %v841_v43 = vmul.f32 %v836_v9, %v2212_v49  ;;  %v842_v37 = vmul.f32 %v838_v34, %v2215_v50  ;;  %v850_v12 = vpop.permute.xlu1 %849  ;;  %v1653_v9 = vld [vmem:[%s2901_s4] ss:$8 sps:$4 sm:$0xff]  }
 0x2b7   : > { %v853_v23 = vsel %vm602_vm6, %v2354_v51, %v850_v12  ;;  %v855_v24 = vsel %vm602_vm6, %v850_v12, %v2354_v51  ;;  %930 = vmatpush1.bf16.msra.mxu1 %v825_v32 }
 0x2b8   : > { %v852_v33 = vpop.permute.xlu0 %851  ;;  %v844_v48 = vpack.c.bf16 %v842_v37, %v840_v36  ;;  %v843_v11 = vpack.c.bf16 %v841_v43, %v839_v35  ;;  %v857_v56 = vmul.f32 %v853_v23, %v2238_v1  ;;  %v858_v57 = vmul.f32 %v855_v24, %v2241_v2 }
 0x2b9   : > { %v854_v38 = vsel %vm602_vm6, %v2356_v52, %v852_v33  ;;  %v856_v55 = vsel %vm602_vm6, %v852_v33, %v2356_v52 }
 0x2ba   : > { %v859_v51 = vmul.f32 %v854_v38, %v2238_v1  ;;  %v860_v21 = vmul.f32 %v856_v55, %v2241_v2  ;;  %v868_v22 = vpop.permute.xlu1 %867  ;;  %931 = vmatprep.subr.bf16.mxu1 %v844_v48 }
 0x2bb   : > { %v871_v32 = vsel %vm629_vm7, %v2358_v53, %v868_v22  ;;  %v873_v58 = vsel %vm629_vm7, %v868_v22, %v2358_v53  ;;  %932 = vmatpush1.bf16.msra.mxu1 %v843_v11 }
 0x2bc   : > { %v870_v52 = vpop.permute.xlu0 %869  ;;  %v862_v59 = vpack.c.bf16 %v860_v21, %v858_v57  ;;  %v861_v39 = vpack.c.bf16 %v859_v51, %v857_v56  ;;  %v875_v19 = vmul.f32 %v871_v32, %v2258_v26  ;;  %v876_v60 = vmul.f32 %v873_v58, %v2261_v27  ;;  %v1656_v58 = vld [vmem:[#allocation8 + $0x4] ss:$8 sps:$4 sm:$0xff]  }
 0x2bd   : > { %v872_v15 = vsel %vm629_vm7, %v2360_v54, %v870_v52  ;;  %v874_v16 = vsel %vm629_vm7, %v870_v52, %v2360_v54  ;;  %1552 = vmatprep.mubr.msk.bf16.mxu0 %vm694_vm0, %v1656_v58  ;;  %v970_v52 = vld [vmem:[%s2904_s7] sm:$0xff] }
 0x2be   : > { %v877_v40 = vmul.f32 %v872_v15, %v2258_v26  ;;  %v878_v53 = vmul.f32 %v874_v16, %v2261_v27  ;;  %v886_v61 = vpop.permute.xlu1 %885  ;;  %933 = vmatprep.subr.bf16.mxu1 %v862_v59  ;;  %v971_v59 = vld [vmem:[%s2904_s7 + $0x8] sm:$0xff] }
 0x2bf   : > { %v889_v62 = vsel %vm656_vm8, %v882_v41, %v886_v61  ;;  %v891_v3 = vsel %vm656_vm8, %v886_v61, %v882_v41  ;;  %934 = vmatpush1.bf16.msra.mxu1 %v861_v39 }
 0x2c0   : > { %v888_v4 = vpop.permute.xlu0 %887  ;;  %v880_v5 = vpack.c.bf16 %v878_v53, %v876_v60  ;;  %v879_v54 = vpack.c.bf16 %v877_v40, %v875_v19  ;;  %v893_v6 = vmul.f32 %v2276_v44, %v889_v62  ;;  %v894_v7 = vmul.f32 %v2278_v45, %v891_v3 }
 0x2c1   : > { %v890_v17 = vsel %vm656_vm8, %v884_v18, %v888_v4  ;;  %v892_v20 = vsel %vm656_vm8, %v888_v4, %v884_v18 }
 0x2c2   : > { %v895_v42 = vmul.f32 %v2276_v44, %v890_v17  ;;  %v896_v8 = vmul.f32 %v2278_v45, %v892_v20  ;;  %935 = vmatprep.subr.bf16.mxu1 %v880_v5 }
 0x2c3   : > { %936 = vmatpush1.bf16.msra.mxu1 %v879_v54 }
 0x2c4   : > { %v898_v41 = vpack.c.bf16 %v896_v8, %v894_v7  ;;  %v897_v10 = vpack.c.bf16 %v895_v42, %v893_v6 }
 0x2c6   : > { %937 = vmatprep.subr.bf16.mxu1 %v898_v41 }
 0x2c7   : > { %938 = vmatpush1.bf16.msra.mxu1 %v897_v10 }
 0x2ca   : > { %954 = vmatmul.mubr.bf16.vlgmr.msra.gmra.mrb[0].mxu1 %v1653_v9 }
 0x2cf   : > { %v902_v18 = vpop.permute.xlu1 %901 }
 0x2d1   : > { %v907_v43 = vpop.permute.xlu0 %906 }
 0x39d   : > { %v955_v34 = vpop.f32.mrb[0].mxu1 }
 0x39e   : > { %v956_v35 = vadd.f32 %v955_v34, %v902_v18  ;;  %v957_v36 = vpop.f32.mrb[1].mxu1 }
 0x39f   : > { %v958_v37 = vadd.f32 %v957_v36, %v902_v18  ;;  %v959_v12 = vpop.f32.mrb[2].mxu1 }
 0x3a0   : > { %v964_v23 = vmax.f32 %v956_v35, 0.0  ;;  %v960_v24 = vadd.f32 %v959_v12, %v907_v43  ;;  %v961_v33 = vpop.f32.mrb[3].mxu1 }
 0x3a1   : > { %v965_v48 = vmax.f32 %v958_v37, 0.0  ;;  %v962_v11 = vadd.f32 %v961_v33, %v907_v43 }
 0x3a2   : > { %v966_v38 = vmax.f32 %v960_v24, 0.0  ;;  %972 = vrot.lane.b32.xlu1 %v964_v23, %s1827_s26  ;;  %v2482_v56 = vmul.f32 %v964_v23, %v2080_v14 }
 0x3a3   : > { %v967_v55 = vmax.f32 %v962_v11, 0.0  ;;  %v2488_v51 = vmul.f32 %v965_v48, %v2077_v13 }
 0x3a4   : > { %974 = vrot.lane.b32.xlu0 %v966_v38, %s1827_s26  ;;  %v2485_v57 = vmul.f32 %v966_v38, %v2080_v14 }
 0x3a5   : > { %v2491_v21 = vmul.f32 %v967_v55, %v2077_v13 }
 0x3a6   : > { %990 = vrot.lane.b32.xlu1 %v964_v23, %s1828_s12  ;;  %v1048_v22 = vpack.c.bf16 %v2485_v57, %v2482_v56 }
 0x3a7   : > { %v1049_v32 = vpack.c.bf16 %v2491_v21, %v2488_v51 }
 0x3a8   : > { %992 = vrot.lane.b32.xlu0 %v966_v38, %s1828_s12 }
 0x3aa   : > { %1008 = vrot.lane.b32.xlu1 %v964_v23, %s1829_s28 }
 0x3ac   : > { %1010 = vrot.lane.b32.xlu0 %v966_v38, %s1829_s28 }
 0x3ae   : > { %1026 = vrot.lane.b32.xlu1 %v964_v23, %s1830_s11 }
 0x3b0   : > { %1028 = vrot.lane.b32.xlu0 %v966_v38, %s1830_s11 }
 0x3b2   : > { %1050 = vrot.lane.b32.xlu1 %v964_v23, %s1831_s22 }
 0x3b4   : > { %1052 = vrot.lane.b32.xlu0 %v966_v38, %s1831_s22 }
 0x3b6   : > { %1068 = vrot.lane.b32.xlu1 %v964_v23, %s1832_s13 }
 0x3b8   : > { %1070 = vrot.lane.b32.xlu0 %v966_v38, %s1832_s13 }
 0x3ba   : > { %1086 = vrot.lane.b32.xlu1 %v964_v23, %s1833_s2 }
 0x3bc   : > { %1088 = vrot.lane.b32.xlu0 %v966_v38, %s1833_s2 }
 0x3be   : > { %976 = vrot.lane.b32.xlu1 %v965_v48, %s1827_s26 }
 0x3c0   : > { %978 = vrot.lane.b32.xlu0 %v967_v55, %s1827_s26 }
 0x3c2   : > { %994 = vrot.lane.b32.xlu1 %v965_v48, %s1828_s12 }
 0x3c4   : > { %996 = vrot.lane.b32.xlu0 %v967_v55, %s1828_s12 }
 0x3c6   : > { %1012 = vrot.lane.b32.xlu1 %v965_v48, %s1829_s28 }
 0x3c8   : > { %1014 = vrot.lane.b32.xlu0 %v967_v55, %s1829_s28 }
 0x3ca   : > { %1030 = vrot.lane.b32.xlu1 %v965_v48, %s1830_s11 }
 0x3cc   : > { %1032 = vrot.lane.b32.xlu0 %v967_v55, %s1830_s11 }
 0x3ce   : > { %1104 = vrot.lane.b32.xlu1 %v964_v23, %s1834_s18 }
 0x3d0   : > { %1106 = vrot.lane.b32.xlu0 %v966_v38, %s1834_s18 }
 0x3d2   : > { %1054 = vrot.lane.b32.xlu1 %v965_v48, %s1831_s22 }
 0x3d4   : > { %1056 = vrot.lane.b32.xlu0 %v967_v55, %s1831_s22 }
 0x3d6   : > { %1072 = vrot.lane.b32.xlu1 %v965_v48, %s1832_s13 }
 0x3d8   : > { %1074 = vrot.lane.b32.xlu0 %v967_v55, %s1832_s13 }
 0x3da   : > { %1090 = vrot.lane.b32.xlu1 %v965_v48, %s1833_s2 }
 0x3dc   : > { %1092 = vrot.lane.b32.xlu0 %v967_v55, %s1833_s2 }
 0x3de   : > { %1108 = vrot.lane.b32.xlu1 %v965_v48, %s1834_s18 }
 0x3e0   : > { %1110 = vrot.lane.b32.xlu0 %v967_v55, %s1834_s18 }
 0x3e2   : > { %1124 = vperm.xlu1 %1649, %v970_v52  }
 0x3e4   : > { %1129 = vperm.xlu0 %1648, %v971_v59  }
 0x414   : > { %v973_v39 = vpop.permute.xlu1 %972 }
 0x416   : > { %v975_v15 = vpop.permute.xlu0 %974 }
 0x418   : > { %v991_v16 = vpop.permute.xlu1 %990 }
 0x41a   : > { %v993_v19 = vpop.permute.xlu0 %992 }
 0x41c   : > { %v1009_v60 = vpop.permute.xlu1 %1008 }
 0x41e   : > { %v1011_v40 = vpop.permute.xlu0 %1010 }
 0x420   : > { %v1027_v53 = vpop.permute.xlu1 %1026 }
 0x422   : > { %v1029_v61 = vpop.permute.xlu0 %1028 }
 0x424   : > { %v2534_v62 = vpop.permute.xlu1 %1050 }
 0x426   : > { %v2536_v3 = vpop.permute.xlu0 %1052 }
 0x428   : > { %v2538_v4 = vpop.permute.xlu1 %1068 }
 0x42a   : > { %v2540_v5 = vpop.permute.xlu0 %1070 }
 0x42c   : > { %v2542_v54 = vpop.permute.xlu1 %1086 }
 0x42e   : > { %v2544_v17 = vpop.permute.xlu0 %1088 }
 0x430   : > { %v977_v20 = vpop.permute.xlu1 %976 }
 0x431   : > { %v980_v6 = vsel %vm453_vm1, %v973_v39, %v977_v20  ;;  %v982_v7 = vsel %vm453_vm1, %v977_v20, %v973_v39 }
 0x432   : > { %v979_v42 = vpop.permute.xlu0 %978  ;;  %v984_v10 = vmul.f32 %v982_v7, %v2135_v30  ;;  %v985_v9 = vmul.f32 %v980_v6, %v2132_v29 }
 0x433   : > { %v981_v8 = vsel %vm453_vm1, %v975_v15, %v979_v42  ;;  %v983_v41 = vsel %vm453_vm1, %v979_v42, %v975_v15 }
 0x434   : > { %v986_v18 = vmul.f32 %v983_v41, %v2135_v30  ;;  %v987_v34 = vmul.f32 %v981_v8, %v2132_v29  ;;  %v995_v35 = vpop.permute.xlu1 %994 }
 0x435   : > { %v998_v36 = vsel %vm480_vm2, %v991_v16, %v995_v35  ;;  %v1000_v43 = vsel %vm480_vm2, %v995_v35, %v991_v16 }
 0x436   : > { %v988_v37 = vpack.c.bf16 %v986_v18, %v984_v10  ;;  %v997_v12 = vpop.permute.xlu0 %996  ;;  %v989_v23 = vpack.c.bf16 %v987_v34, %v985_v9  ;;  %v1002_v48 = vmul.f32 %v1000_v43, %v2152_v46  ;;  %v1003_v11 = vmul.f32 %v998_v36, %v2155_v47 }
 0x437   : > { %v999_v24 = vsel %vm480_vm2, %v993_v19, %v997_v12  ;;  %v1001_v33 = vsel %vm480_vm2, %v997_v12, %v993_v19 }
 0x438   : > { %v1004_v38 = vmul.f32 %v1001_v33, %v2152_v46  ;;  %v1005_v55 = vmul.f32 %v999_v24, %v2155_v47  ;;  %1144 = vmatprep.subr.bf16.mxu0 %v989_v23  ;;  %v1013_v58 = vpop.permute.xlu1 %1012 }
 0x439   : > { %v1016_v52 = vsel %vm507_vm3, %v1009_v60, %v1013_v58  ;;  %v1018_v59 = vsel %vm507_vm3, %v1013_v58, %v1009_v60  ;;  %1145 = vmatpush1.bf16.msra.mxu0 %v988_v37 }
 0x43a   : > { %v1006_v39 = vpack.c.bf16 %v1004_v38, %v1002_v48  ;;  %v1015_v15 = vpop.permute.xlu0 %1014  ;;  %v1007_v16 = vpack.c.bf16 %v1005_v55, %v1003_v11  ;;  %v1020_v6 = vmul.f32 %v1018_v59, %v2172_v63  ;;  %v1021_v7 = vmul.f32 %v1016_v52, %v2175_v0 }
 0x43b   : > { %v1017_v19 = vsel %vm507_vm3, %v1011_v40, %v1015_v15  ;;  %v1019_v20 = vsel %vm507_vm3, %v1015_v15, %v1011_v40 }
 0x43c   : > { %v1022_v42 = vmul.f32 %v1019_v20, %v2172_v63  ;;  %v1023_v8 = vmul.f32 %v1017_v19, %v2175_v0  ;;  %1146 = vmatprep.subr.bf16.mxu0 %v1007_v16  ;;  %v1031_v60 = vpop.permute.xlu1 %1030 }
 0x43d   : > { %v1034_v41 = vsel %vm534_vm4, %v1027_v53, %v1031_v60  ;;  %v1036_v10 = vsel %vm534_vm4, %v1031_v60, %v1027_v53  ;;  %1147 = vmatpush1.bf16.msra.mxu0 %v1006_v39 }
 0x43e   : > { %v1024_v9 = vpack.c.bf16 %v1022_v42, %v1020_v6  ;;  %v1033_v18 = vpop.permute.xlu0 %1032  ;;  %v1025_v40 = vpack.c.bf16 %v1023_v8, %v1021_v7  ;;  %v1038_v36 = vmul.f32 %v1036_v10, %v2192_v28  ;;  %v1039_v43 = vmul.f32 %v1034_v41, %v2195_v31 }
 0x43f   : > { %v1035_v34 = vsel %vm534_vm4, %v1029_v61, %v1033_v18  ;;  %v1037_v35 = vsel %vm534_vm4, %v1033_v18, %v1029_v61 }
 0x440   : > { %v1040_v37 = vmul.f32 %v1037_v35, %v2192_v28  ;;  %v1041_v12 = vmul.f32 %v1035_v34, %v2195_v31  ;;  %1148 = vmatprep.subr.bf16.mxu0 %v1025_v40  ;;  %v1105_v53 = vpop.permute.xlu1 %1104 }
 0x441   : > { %1149 = vmatpush1.bf16.msra.mxu0 %v1024_v9 }
 0x442   : > { %v1042_v23 = vpack.c.bf16 %v1040_v37, %v1038_v36  ;;  %v1107_v24 = vpop.permute.xlu0 %1106  ;;  %v1043_v33 = vpack.c.bf16 %v1041_v12, %v1039_v43 }
 0x444   : > { %1150 = vmatprep.subr.bf16.mxu0 %v1043_v33  ;;  %v1055_v48 = vpop.permute.xlu1 %1054 }
 0x445   : > { %v1058_v61 = vsel %vm575_vm5, %v2534_v62, %v1055_v48  ;;  %v1060_v11 = vsel %vm575_vm5, %v1055_v48, %v2534_v62  ;;  %1151 = vmatpush1.bf16.msra.mxu0 %v1042_v23 }
 0x446   : > { %v1057_v38 = vpop.permute.xlu0 %1056  ;;  %1152 = vmatprep.subr.bf16.mxu0 %v1049_v32  ;;  %v1062_v52 = vmul.f32 %v1058_v61, %v2212_v49  ;;  %v1063_v59 = vmul.f32 %v1060_v11, %v2215_v50 }
 0x447   : > { %v1059_v55 = vsel %vm575_vm5, %v2536_v3, %v1057_v38  ;;  %v1061_v58 = vsel %vm575_vm5, %v1057_v38, %v2536_v3 }
 0x448   : > { %v1064_v62 = vmul.f32 %v1059_v55, %v2212_v49  ;;  %v1065_v39 = vmul.f32 %v1061_v58, %v2215_v50  ;;  %v1073_v15 = vpop.permute.xlu1 %1072  ;;  %v1658_v55 = vld [vmem:[#allocation8] ss:$8 sps:$4 sm:$0xff]  }
 0x449   : > { %v1076_v51 = vsel %vm602_vm6, %v2538_v4, %v1073_v15  ;;  %v1078_v21 = vsel %vm602_vm6, %v1073_v15, %v2538_v4  ;;  %1153 = vmatpush1.bf16.msra.mxu0 %v1048_v22 }
 0x44a   : > { %v1066_v32 = vpack.c.bf16 %v1064_v62, %v1062_v52  ;;  %v1075_v3 = vpop.permute.xlu0 %1074  ;;  %v1067_v16 = vpack.c.bf16 %v1065_v39, %v1063_v59  ;;  %v1080_v6 = vmul.f32 %v1076_v51, %v2238_v1  ;;  %v1081_v7 = vmul.f32 %v1078_v21, %v2241_v2 }
 0x44b   : > { %v1077_v19 = vsel %vm602_vm6, %v2540_v5, %v1075_v3  ;;  %v1079_v20 = vsel %vm602_vm6, %v1075_v3, %v2540_v5 }
 0x44c   : > { %v1082_v4 = vmul.f32 %v1077_v19, %v2238_v1  ;;  %v1083_v56 = vmul.f32 %v1079_v20, %v2241_v2  ;;  %v1091_v57 = vpop.permute.xlu1 %1090  ;;  %1154 = vmatprep.subr.bf16.mxu0 %v1067_v16 }
 0x44d   : > { %v1094_v22 = vsel %vm629_vm7, %v2542_v54, %v1091_v57  ;;  %v1096_v42 = vsel %vm629_vm7, %v1091_v57, %v2542_v54  ;;  %1155 = vmatpush1.bf16.msra.mxu0 %v1066_v32  ;;  %v1194_v57 = vld [vmem:[%s2906_s9 + $0x8] sm:$0xff] }
 0x44e   : > { %v1084_v5 = vpack.c.bf16 %v1082_v4, %v1080_v6  ;;  %v1093_v8 = vpop.permute.xlu0 %1092  ;;  %v1085_v60 = vpack.c.bf16 %v1083_v56, %v1081_v7  ;;  %v1098_v9 = vmul.f32 %v1094_v22, %v2258_v26  ;;  %v1099_v18 = vmul.f32 %v1096_v42, %v2261_v27 }
 0x44f   : > { %v1095_v41 = vsel %vm629_vm7, %v2544_v17, %v1093_v8  ;;  %v1097_v10 = vsel %vm629_vm7, %v1093_v8, %v2544_v17 }
 0x450   : > { %v1100_v40 = vmul.f32 %v1095_v41, %v2258_v26  ;;  %v1101_v54 = vmul.f32 %v1097_v10, %v2261_v27  ;;  %v1109_v34 = vpop.permute.xlu1 %1108  ;;  %1156 = vmatprep.subr.bf16.mxu0 %v1085_v60 }
 0x451   : > { %v1112_v35 = vsel %vm656_vm8, %v1105_v53, %v1109_v34  ;;  %v1114_v36 = vsel %vm656_vm8, %v1109_v34, %v1105_v53  ;;  %1157 = vmatpush1.bf16.msra.mxu0 %v1084_v5 }
 0x452   : > { %v1102_v43 = vpack.c.bf16 %v1100_v40, %v1098_v9  ;;  %v1111_v37 = vpop.permute.xlu0 %1110  ;;  %v1103_v17 = vpack.c.bf16 %v1101_v54, %v1099_v18  ;;  %v1116_v33 = vmul.f32 %v2276_v44, %v1112_v35  ;;  %v1117_v48 = vmul.f32 %v2278_v45, %v1114_v36 }
 0x453   : > { %v1113_v12 = vsel %vm656_vm8, %v1107_v24, %v1111_v37  ;;  %v1115_v23 = vsel %vm656_vm8, %v1111_v37, %v1107_v24 }
 0x454   : > { %v1118_v61 = vmul.f32 %v2276_v44, %v1113_v12  ;;  %v1119_v11 = vmul.f32 %v2278_v45, %v1115_v23  ;;  %1158 = vmatprep.subr.bf16.mxu0 %v1103_v17 }
 0x455   : > { %1159 = vmatpush1.bf16.msra.mxu0 %v1102_v43 }
 0x456   : > { %v1120_v53 = vpack.c.bf16 %v1118_v61, %v1116_v33  ;;  %v1121_v38 = vpack.c.bf16 %v1119_v11, %v1117_v48 }
 0x458   : > { %1160 = vmatprep.subr.bf16.mxu0 %v1121_v38 }
 0x459   : > { %1161 = vmatpush1.bf16.msra.mxu0 %v1120_v53 }
 0x45c   : > { %1177 = vmatmul.mubr.bf16.vlgmr.msra.gmra.mrb[4].mxu0 %v1658_v55 }
 0x461   : > { %v1125_v58 = vpop.permute.xlu1 %1124 }
 0x463   : > { %v1130_v62 = vpop.permute.xlu0 %1129 }
 0x52f   : > { %v1178_v52 = vpop.f32.mrb[4].mxu0 }
 0x530   : > { %v1179_v59 = vadd.f32 %v1178_v52, %v1125_v58  ;;  %v1180_v24 = vpop.f32.mrb[5].mxu0 }
 0x531   : > { %v1181_v39 = vadd.f32 %v1180_v24, %v1125_v58  ;;  %v1182_v15 = vpop.f32.mrb[6].mxu0 }
 0x532   : > { %v1187_v51 = vmax.f32 %v1179_v59, 0.0  ;;  %v1183_v21 = vadd.f32 %v1182_v15, %v1130_v62  ;;  %v1184_v44 = vpop.f32.mrb[7].mxu0 }
 0x533   : > { %v1188_v32 = vmax.f32 %v1181_v39, 0.0  ;;  %v1185_v45 = vadd.f32 %v1184_v44, %v1130_v62 }
 0x534   : > { %v1189_v3 = vmax.f32 %v1183_v21, 0.0  ;;  %1195 = vrot.lane.b32.xlu1 %v1187_v51, %s1827_s26  ;;  %v2663_v19 = vmul.f32 %v1187_v51, %v2080_v14 }
 0x535   : > { %v1190_v16 = vmax.f32 %v1185_v45, 0.0  ;;  %v2669_v6 = vmul.f32 %v1188_v32, %v2077_v13 }
 0x536   : > { %1197 = vrot.lane.b32.xlu0 %v1189_v3, %s1827_s26  ;;  %v2666_v20 = vmul.f32 %v1189_v3, %v2080_v14  ;;  %v1193_v14 = vld [vmem:[%s2906_s9] sm:$0xff] }
 0x537   : > { %v2672_v7 = vmul.f32 %v1190_v16, %v2077_v13  ;;  %v1659_v13 = vld [vmem:[%s2905_s8 + $0x4] ss:$8 sps:$4 sm:$0xff]  }
 0x538   : > { %1213 = vrot.lane.b32.xlu1 %v1187_v51, %s1828_s12  ;;  %v1271_v4 = vpack.c.bf16 %v2666_v20, %v2663_v19  ;;  %1555 = vmatprep.mubr.msk.bf16.mxu1 %vm694_vm0, %v1659_v13 }
 0x539   : > { %v1272_v56 = vpack.c.bf16 %v2672_v7, %v2669_v6 }
 0x53a   : > { %1215 = vrot.lane.b32.xlu0 %v1189_v3, %s1828_s12 }
 0x53c   : > { %1231 = vrot.lane.b32.xlu1 %v1187_v51, %s1829_s28 }
 0x53e   : > { %1233 = vrot.lane.b32.xlu0 %v1189_v3, %s1829_s28 }
 0x540   : > { %1249 = vrot.lane.b32.xlu1 %v1187_v51, %s1830_s11 }
 0x542   : > { %1251 = vrot.lane.b32.xlu0 %v1189_v3, %s1830_s11 }
 0x544   : > { %1273 = vrot.lane.b32.xlu1 %v1187_v51, %s1831_s22 }
 0x546   : > { %1275 = vrot.lane.b32.xlu0 %v1189_v3, %s1831_s22 }
 0x548   : > { %1291 = vrot.lane.b32.xlu1 %v1187_v51, %s1832_s13 }
 0x54a   : > { %1293 = vrot.lane.b32.xlu0 %v1189_v3, %s1832_s13 }
 0x54c   : > { %1309 = vrot.lane.b32.xlu1 %v1187_v51, %s1833_s2 }
 0x54e   : > { %1311 = vrot.lane.b32.xlu0 %v1189_v3, %s1833_s2 }
 0x550   : > { %1199 = vrot.lane.b32.xlu1 %v1188_v32, %s1827_s26 }
 0x552   : > { %1201 = vrot.lane.b32.xlu0 %v1190_v16, %s1827_s26  ;;  %s1748_s26 = scalar_lea.vmem %s2845_s29, 512 }
 0x553   : > { %p1749_p1 = scmp.ne.s32.totalorder %s2845_s29, %s1748_s26 }
 0x554   : > { %1217 = vrot.lane.b32.xlu1 %v1188_v32, %s1828_s12 }
 0x555   : > { %p1750_p4 = pnand %p1749_p1, %p2944_p3 }
 0x556   : > { %1219 = vrot.lane.b32.xlu0 %v1190_v16, %s1828_s12 }
 0x557   : > { %p1751_p7 = pneg %p1750_p4 }
 0x558   : > { %1235 = vrot.lane.b32.xlu1 %v1188_v32, %s1829_s28 }
 0x55a   : > { %1237 = vrot.lane.b32.xlu0 %v1190_v16, %s1829_s28  ;;  %s1752_s28 = sshll.u32 %s1836_s27, 4  ;;  %s1753_s28 = int_to_ptr.vmem [resolvable:$false] %s1752_s28 }
 0x55b   : > { %p1755_p8 = scmp.lt.s32.totalorder %s2845_s29, %s1753_s28 }
 0x55c   : > { %1253 = vrot.lane.b32.xlu1 %v1188_v32, %s1830_s11 }
 0x55e   : > { %1255 = vrot.lane.b32.xlu0 %v1190_v16, %s1830_s11  ;;  %s1754_s11 = scalar_lea.vmem %s1753_s28, 1024 }
 0x55f   : > { %p1756_p9 = scmp.lt.s32.totalorder %s1754_s11, %s1748_s26 }
 0x560   : > { %1327 = vrot.lane.b32.xlu1 %v1187_v51, %s1834_s18 }
 0x561   : > { %p1757_p13 = por %p1756_p9, %p1755_p8 }
 0x562   : > { %1329 = vrot.lane.b32.xlu0 %v1189_v3, %s1834_s18 }
 0x563   : > { %p1758_p2 = pnand %p1757_p13, %p1751_p7 }
 0x564   : > { %1277 = vrot.lane.b32.xlu1 %v1188_v32, %s1831_s22 }
 0x566   : > { %1279 = vrot.lane.b32.xlu0 %v1190_v16, %s1831_s22 }
 0x568   : > { %1295 = vrot.lane.b32.xlu1 %v1188_v32, %s1832_s13 }
 0x56a   : > { %1297 = vrot.lane.b32.xlu0 %v1190_v16, %s1832_s13 }
 0x56c   : > { %1313 = vrot.lane.b32.xlu1 %v1188_v32, %s1833_s2 }
 0x56e   : > { %1315 = vrot.lane.b32.xlu0 %v1190_v16, %s1833_s2 }
 0x570   : > { %1331 = vrot.lane.b32.xlu1 %v1188_v32, %s1834_s18 }
 0x572   : > { %1333 = vrot.lane.b32.xlu0 %v1190_v16, %s1834_s18 }
 0x574   : > { %1347 = vperm.xlu1 %1649, %v1193_v14  }
 0x576   : > { %1352 = vperm.xlu0 %1648, %v1194_v57  }
 0x5a6   : > { %v1196_v22 = vpop.permute.xlu1 %1195 }
 0x5a8   : > { %v1198_v42 = vpop.permute.xlu0 %1197 }
 0x5aa   : > { %v1214_v5 = vpop.permute.xlu1 %1213 }
 0x5ac   : > { %v1216_v8 = vpop.permute.xlu0 %1215 }
 0x5ae   : > { %v1232_v60 = vpop.permute.xlu1 %1231 }
 0x5b0   : > { %v1234_v41 = vpop.permute.xlu0 %1233 }
 0x5b2   : > { %v1250_v10 = vpop.permute.xlu1 %1249 }
 0x5b4   : > { %v1252_v9 = vpop.permute.xlu0 %1251 }
 0x5b6   : > { %v2718_v18 = vpop.permute.xlu1 %1273 }
 0x5b8   : > { %v2720_v40 = vpop.permute.xlu0 %1275 }
 0x5ba   : > { %v2722_v54 = vpop.permute.xlu1 %1291 }
 0x5bc   : > { %v2724_v34 = vpop.permute.xlu0 %1293 }
 0x5be   : > { %v2726_v35 = vpop.permute.xlu1 %1309 }
 0x5c0   : > { %v2728_v36 = vpop.permute.xlu0 %1311 }
 0x5c2   : > { %v1200_v43 = vpop.permute.xlu1 %1199 }
 0x5c3   : > { %v1203_v37 = vsel %vm453_vm1, %v1196_v22, %v1200_v43  ;;  %v1205_v17 = vsel %vm453_vm1, %v1200_v43, %v1196_v22 }
 0x5c4   : > { %v1202_v12 = vpop.permute.xlu0 %1201  ;;  %v1207_v48 = vmul.f32 %v1205_v17, %v2135_v30  ;;  %v1208_v61 = vmul.f32 %v1203_v37, %v2132_v29 }
 0x5c5   : > { %v1204_v23 = vsel %vm453_vm1, %v1198_v42, %v1202_v12  ;;  %v1206_v33 = vsel %vm453_vm1, %v1202_v12, %v1198_v42 }
 0x5c6   : > { %v1209_v11 = vmul.f32 %v1206_v33, %v2135_v30  ;;  %v1210_v53 = vmul.f32 %v1204_v23, %v2132_v29  ;;  %v1218_v38 = vpop.permute.xlu1 %1217 }
 0x5c7   : > { %v1221_v55 = vsel %vm480_vm2, %v1214_v5, %v1218_v38  ;;  %v1223_v58 = vsel %vm480_vm2, %v1218_v38, %v1214_v5 }
 0x5c8   : > { %v1211_v52 = vpack.c.bf16 %v1209_v11, %v1207_v48  ;;  %v1220_v59 = vpop.permute.xlu0 %1219  ;;  %v1212_v24 = vpack.c.bf16 %v1210_v53, %v1208_v61  ;;  %v1225_v30 = vmul.f32 %v1223_v58, %v2152_v46  ;;  %v1226_v29 = vmul.f32 %v1221_v55, %v2155_v47 }
 0x5c9   : > { %v1222_v62 = vsel %vm480_vm2, %v1216_v8, %v1220_v59  ;;  %v1224_v39 = vsel %vm480_vm2, %v1220_v59, %v1216_v8 }
 0x5ca   : > { %v1227_v15 = vmul.f32 %v1224_v39, %v2152_v46  ;;  %v1228_v51 = vmul.f32 %v1222_v62, %v2155_v47  ;;  %1367 = vmatprep.subr.bf16.mxu1 %v1212_v24  ;;  %v1236_v21 = vpop.permute.xlu1 %1235 }
 0x5cb   : > { %v1239_v44 = vsel %vm507_vm3, %v1232_v60, %v1236_v21  ;;  %v1241_v32 = vsel %vm507_vm3, %v1236_v21, %v1232_v60  ;;  %1368 = vmatpush1.bf16.msra.mxu1 %v1211_v52 }
 0x5cc   : > { %v1229_v45 = vpack.c.bf16 %v1227_v15, %v1225_v30  ;;  %v1238_v3 = vpop.permute.xlu0 %1237  ;;  %v1230_v16 = vpack.c.bf16 %v1228_v51, %v1226_v29  ;;  %v1243_v47 = vmul.f32 %v1241_v32, %v2172_v63  ;;  %v1244_v14 = vmul.f32 %v1239_v44, %v2175_v0 }
 0x5cd   : > { %v1240_v13 = vsel %vm507_vm3, %v1234_v41, %v1238_v3  ;;  %v1242_v46 = vsel %vm507_vm3, %v1238_v3, %v1234_v41 }
 0x5ce   : > { %v1245_v57 = vmul.f32 %v1242_v46, %v2172_v63  ;;  %v1246_v22 = vmul.f32 %v1240_v13, %v2175_v0  ;;  %1369 = vmatprep.subr.bf16.mxu1 %v1230_v16  ;;  %v1254_v42 = vpop.permute.xlu1 %1253 }
 0x5cf   : > { %v1257_v5 = vsel %vm534_vm4, %v1250_v10, %v1254_v42  ;;  %v1259_v8 = vsel %vm534_vm4, %v1254_v42, %v1250_v10  ;;  %1370 = vmatpush1.bf16.msra.mxu1 %v1229_v45 }
 0x5d0   : > { %v1247_v60 = vpack.c.bf16 %v1245_v57, %v1243_v47  ;;  %v1256_v43 = vpop.permute.xlu0 %1255  ;;  %v1248_v41 = vpack.c.bf16 %v1246_v22, %v1244_v14  ;;  %v1261_v0 = vmul.f32 %v1259_v8, %v2192_v28  ;;  %v1262_v17 = vmul.f32 %v1257_v5, %v2195_v31  ;;  %v1663_v14 = vld [vmem:[#allocation3 + $0x18] ss:$0 sm:$0xff] }
 0x5d1   : > { %v1258_v37 = vsel %vm534_vm4, %v1252_v9, %v1256_v43  ;;  %v1260_v63 = vsel %vm534_vm4, %v1256_v43, %v1252_v9 }
 0x5d2   : > { %v1263_v12 = vmul.f32 %v1260_v63, %v2192_v28  ;;  %v1264_v23 = vmul.f32 %v1258_v37, %v2195_v31  ;;  %1371 = vmatprep.subr.bf16.mxu1 %v1248_v41  ;;  %v1328_v10 = vpop.permute.xlu1 %1327 }
 0x5d3   : > { %1372 = vmatpush1.bf16.msra.mxu1 %v1247_v60  ;;  %v1661_v60 = vld [vmem:[%s2905_s8] ss:$8 sps:$4 sm:$0xff]  }
 0x5d4   : > { %v1265_v33 = vpack.c.bf16 %v1263_v12, %v1261_v0  ;;  %v1330_v48 = vpop.permute.xlu0 %1329  ;;  %v1266_v61 = vpack.c.bf16 %v1264_v23, %v1262_v17 }
 0x5d6   : > { %1373 = vmatprep.subr.bf16.mxu1 %v1266_v61  ;;  %v1278_v11 = vpop.permute.xlu1 %1277 }
 0x5d7   : > { %v1281_v9 = vsel %vm575_vm5, %v2718_v18, %v1278_v11  ;;  %v1283_v53 = vsel %vm575_vm5, %v1278_v11, %v2718_v18  ;;  %1374 = vmatpush1.bf16.msra.mxu1 %v1265_v33 }
 0x5d8   : > { %v1280_v28 = vpop.permute.xlu0 %1279  ;;  %1375 = vmatprep.subr.bf16.mxu1 %v1272_v56  ;;  %v1285_v55 = vmul.f32 %v1281_v9, %v2212_v49  ;;  %v1286_v58 = vmul.f32 %v1283_v53, %v2215_v50 }
 0x5d9   : > { %v1282_v31 = vsel %vm575_vm5, %v2720_v40, %v1280_v28  ;;  %v1284_v38 = vsel %vm575_vm5, %v1280_v28, %v2720_v40 }
 0x5da   : > { %v1287_v18 = vmul.f32 %v1282_v31, %v2212_v49  ;;  %v1288_v52 = vmul.f32 %v1284_v38, %v2215_v50  ;;  %v1296_v59 = vpop.permute.xlu1 %1295 }
 0x5db   : > { %v1299_v6 = vsel %vm602_vm6, %v2722_v54, %v1296_v59  ;;  %v1301_v7 = vsel %vm602_vm6, %v1296_v59, %v2722_v54  ;;  %1376 = vmatpush1.bf16.msra.mxu1 %v1271_v4 }
 0x5dc   : > { %v1289_v56 = vpack.c.bf16 %v1287_v18, %v1285_v55  ;;  %v1298_v40 = vpop.permute.xlu0 %1297  ;;  %v1290_v24 = vpack.c.bf16 %v1288_v52, %v1286_v58  ;;  %v1303_v62 = vmul.f32 %v1299_v6, %v2238_v1  ;;  %v1304_v39 = vmul.f32 %v1301_v7, %v2241_v2 }
 0x5dd   : > { %v1300_v49 = vsel %vm602_vm6, %v2724_v34, %v1298_v40  ;;  %v1302_v50 = vsel %vm602_vm6, %v1298_v40, %v2724_v34 }
 0x5de   : > { %v1305_v54 = vmul.f32 %v1300_v49, %v2238_v1  ;;  %v1306_v19 = vmul.f32 %v1302_v50, %v2241_v2  ;;  %v1314_v20 = vpop.permute.xlu1 %1313  ;;  %1377 = vmatprep.subr.bf16.mxu1 %v1290_v24 }
 0x5df   : > { %v1317_v4 = vsel %vm629_vm7, %v2726_v35, %v1314_v20  ;;  %v1319_v30 = vsel %vm629_vm7, %v1314_v20, %v2726_v35  ;;  %1378 = vmatpush1.bf16.msra.mxu1 %v1289_v56 }
 0x5e0   : > { %v1307_v34 = vpack.c.bf16 %v1305_v54, %v1303_v62  ;;  %v1316_v29 = vpop.permute.xlu0 %1315  ;;  %v1308_v15 = vpack.c.bf16 %v1306_v19, %v1304_v39  ;;  %v1321_v51 = vmul.f32 %v1317_v4, %v2258_v26  ;;  %v1322_v21 = vmul.f32 %v1319_v30, %v2261_v27 }
 0x5e1   : > { %v1318_v1 = vsel %vm629_vm7, %v2728_v36, %v1316_v29  ;;  %v1320_v2 = vsel %vm629_vm7, %v1316_v29, %v2728_v36 }
 0x5e2   : > { %v1323_v44 = vmul.f32 %v1318_v1, %v2258_v26  ;;  %v1324_v35 = vmul.f32 %v1320_v2, %v2261_v27  ;;  %v1332_v32 = vpop.permute.xlu1 %1331  ;;  %1379 = vmatprep.subr.bf16.mxu1 %v1308_v15  ;;  %v1662_v27 = vld [vmem:[#allocation3 + $0x10] ss:$0 sm:$0xff] }
 0x5e3   : > { %v1335_v45 = vsel %vm656_vm8, %v1328_v10, %v1332_v32  ;;  %v1337_v3 = vsel %vm656_vm8, %v1332_v32, %v1328_v10  ;;  %1380 = vmatpush1.bf16.msra.mxu1 %v1307_v34 }
 0x5e4   : > { %v1325_v16 = vpack.c.bf16 %v1323_v44, %v1321_v51  ;;  %v1334_v13 = vpop.permute.xlu0 %1333  ;;  %v1326_v36 = vpack.c.bf16 %v1324_v35, %v1322_v21  ;;  %v1339_v47 = vmul.f32 %v1662_v27, %v1335_v45  ;;  %v1340_v57 = vmul.f32 %v1663_v14, %v1337_v3 }
 0x5e5   : > { %v1336_v46 = vsel %vm656_vm8, %v1330_v48, %v1334_v13  ;;  %v1338_v26 = vsel %vm656_vm8, %v1334_v13, %v1330_v48 }
 0x5e6   : > { %v1341_v22 = vmul.f32 %v1662_v27, %v1336_v46  ;;  %v1342_v42 = vmul.f32 %v1663_v14, %v1338_v26  ;;  %1381 = vmatprep.subr.bf16.mxu1 %v1326_v36 }
 0x5e7   : > { %1382 = vmatpush1.bf16.msra.mxu1 %v1325_v16 }
 0x5e8   : > { %v1343_v5 = vpack.c.bf16 %v1341_v22, %v1339_v47  ;;  %v1344_v8 = vpack.c.bf16 %v1342_v42, %v1340_v57 }
 0x5ea   : > { %1383 = vmatprep.subr.bf16.mxu1 %v1344_v8 }
 0x5eb   : > { %1384 = vmatpush1.bf16.msra.mxu1 %v1343_v5 }
 0x5ee   : > { %1400 = vmatmul.mubr.bf16.vlgmr.msra.gmra.mrb[4].mxu1 %v1661_v60 }
 0x5f3   : > { %v1348_v25 = vpop.permute.xlu1 %1347 }
 0x5f5   : > { %v1353_v63 = vpop.permute.xlu0 %1352 }
 0x6c1   : > { %v1401_v43 = vpop.f32.mrb[4].mxu1 }
 0x6c2   : > { %v1402_v41 = vadd.f32 %v1401_v43, %v1348_v25  ;;  %v1403_v37 = vpop.f32.mrb[5].mxu1 }
 0x6c3   : > { %v1404_v0 = vadd.f32 %v1403_v37, %v1348_v25  ;;  %v1405_v17 = vpop.f32.mrb[6].mxu1 }
 0x6c4   : > { %1410 = vst [vmem:[%s427_s10] sm:$0xff] %v1402_v41  ;;  %v1406_v12 = vadd.f32 %v1405_v17, %v1353_v63  ;;  %v1407_v23 = vpop.f32.mrb[7].mxu1 }
 0x6c5   : > { %1411 = vst [vmem:[%s427_s10 + $0x8] sm:$0xff] %v1404_v0  ;;  %v1408_v10 = vadd.f32 %v1407_v23, %v1353_v63 }
 0x6c6   : > { %1412 = vst [vmem:[%s427_s10 + $0x10] sm:$0xff] %v1406_v12 }
 0x6c7   : > { %1413 = vst [vmem:[%s427_s10 + $0x18] sm:$0xff] %v1408_v10 }
 0x6c8   : > { %1761 = shalt.err (!%p1758_p2)
}
 0x6c9   : > { %s1762_s23 = scalar_lea.hbm %s2850_s30, 512  ;;  %s1766_s2 = scalar_lea.hbm %s2943_s20, 1024 }
 0x6ca   : > { %p1763_p0 = scmp.ne.s32.totalorder %s2850_s30, %s1762_s23  ;;  %p1767_p11 = scmp.lt.u32.totalorder %s2850_s30, %s2943_s20 }
 0x6cb   : > { %p1768_p12 = scmp.lt.u32.totalorder %s1766_s2, %s1762_s23  ;;  %p1770_p4 = scmp.lt.u32.totalorder %s1762_s23, %s2850_s30 }
 0x6cc   : > { %p1764_p6 = pnand %p1763_p0, %p2944_p3 }
 0x6cd   : > { %p1769_p1 = por %p1768_p12, %p1767_p11 }
 0x6ce   : > { %p1765_p10 = pneg %p1764_p6 }
 0x6cf   : > { %p1771_p7 = por %p1770_p4, %p1769_p1 }
 0x6d1   : > { %p1772_p8 = pnand %p1771_p7, %p1765_p10 }
 0x6d3   : > { %1775 = shalt.err (!%p1772_p8)
}
 0x6d4   : > { %s1837_s24 = smov 256   ;;  %s1838_s21 = smov 512  }
 0x6d5   : > { %1575 = dma.vmem_to_hbm [thread:$0]  (%p2944_p3), %s2845_s29, 512, %s2850_s30, %s2854_s17, %s1837_s24, %s1838_s21, %s1828_s12  }
 0x6d6 PF: > { %s2945_s19 = sld [smem:[#allocation13_spill]]  ;;  %s2946_s26 = sld [smem:[#allocation17_spill]] }
 0x6dc   : > { %s1443_s27 = sand.u32 1, %s2945_s19   ;;  %p2947_p9 = scmp.ne.s32.totalorder %s2946_s26, 0 }
 0x6dd   : > { %s1444_s28 = scalar_lea.sflag [#allocation5], %s1443_s27 }
 0x6de   : > { %p1588_p13 = pnand %p1532_p5, %p2947_p9 }
 0x6e0   : > { %1801 = dma.done.wait (!%p1588_p13), %s1444_s28, 512  }
 0x6e1   : > { %1803 = vsyncadd (!%p1588_p13), %s1444_s28, 4294966784  ;;  %s2948_s16 = sld [smem:[#allocation14_spill]]  ;;  %s2949_s11 = sld [smem:[#allocation15_spill]] }
 0x6e2   : > { %s2950_s13 = smov %s1810_s14  ;;  %s2951_s14 = smov %s1814_s15 }
 0x6e7   : > { %p22_p2 = scmp.ge.s32.totalorder %s2948_s16, 4   ;;  %s2952_s15 = smov %s2949_s11 }
 0x6e9   :  { %24 = sbr.rel (!%p22_p2) target bundleno = 8 (0x8), region = 136 }
 0x6f0   :  { %1449 = vsyncpa [#allocation4], 1 }
 0x6f1   :  { %1451 = vsyncpa [#allocation4 + $0x1], 1 }
 0x6f2   :  { %1452 = vsyncpa [#allocation7], 1 }
 0x6f3   :  { %1453 = vsyncpa [#allocation5], 1 }
 0x6f4   :  { %1455 = vsyncpa [#allocation5 + $0x1], 1 }

</bundles_post_ra>
